<compile_context>
chip_gen: v5e
topology: v5e:2x2
jax: 0.10.0
libtpu: 0.0.40
codegen_flags: <defaults>
</compile_context>

<pallas_src>
import functools

import jax
import jax.numpy as jnp
from jax.experimental import pallas as pl
from jax.experimental.pallas import tpu as pltpu


def _pick_co_tile(cout):
    """Largest Cout tile <= 256 that divides Cout and is a multiple of 8.

    Full Cout when it is small / not 8-aligned (block == full dim is legal).
    The Cout grid axis is 'arbitrary' (im2col cache), so splitting it buys no
    megacore parallelism -- only VMEM relief for very wide layers.
    """
    if cout <= 256 or cout % 8 != 0:
        return cout
    for t in range(256, 7, -8):
        if cout % t == 0:
            return t
    return cout


def _conv_block_kernel(*refs, ks, st, Ho, Wo, eps, last, cached):
    """One batch image x one Cout tile.

    refs (depending on static flags):
      x_ref: (1, Cin, Hp, Wp) bf16
      w_ref: (co, ks*ks*Cin) bf16
      b_ref: (co, 1) f32            (only when last=True)
      o_ref: (1, co, Ho*Wo) bf16
      p_ref: (ks*ks*Cin, Ho*Wo) bf16 VMEM scratch (only when cached)
    """
    if last:
        if cached:
            x_ref, w_ref, b_ref, o_ref, p_ref = refs
        else:
            x_ref, w_ref, b_ref, o_ref = refs
            p_ref = None
    else:
        if cached:
            x_ref, w_ref, o_ref, p_ref = refs
        else:
            x_ref, w_ref, o_ref = refs
            p_ref = None

    Cin = x_ref.shape[1]
    K = ks * ks * Cin

    def build_patches():
        x = x_ref[0]                              # (Cin, Hp, Wp) bf16
        wins = []
        for ky in range(ks):                      # ks is small & static
            for kx in range(ks):
                win = jax.lax.slice(
                    x,
                    (0, ky, kx),
                    (Cin, ky + st * (Ho - 1) + 1, kx + st * (Wo - 1) + 1),
                    (1, st, st))                  # (Cin, Ho, Wo)
                wins.append(win)
        return jnp.concatenate(wins, axis=0).reshape(K, Ho * Wo)

    if p_ref is None:
        patches = build_patches()
    else:
        # Build im2col only on the first Cout tile of this image; reuse after.
        @pl.when(pl.program_id(1) == 0)
        def _():
            p_ref[...] = build_patches()
        patches = p_ref[...]

    # Single weights-stationary MXU matmul: (co, K) @ (K, Ho*Wo) -> (co, Ho*Wo) f32.
    acc = jnp.dot(w_ref[...], patches, preferred_element_type=jnp.float32)

    if last:
        acc = acc + b_ref[...]                    # (co, 1) broadcasts over lanes
        o_ref[0] = jnp.tanh(acc).astype(o_ref.dtype)
    else:
        # Bias is skipped: InstanceNorm's mean subtraction cancels it exactly.
        # InstanceNorm2d(affine=False): per-channel, biased variance over spatial.
        mean = jnp.mean(acc, axis=1, keepdims=True)
        cen = acc - mean
        var = jnp.mean(cen * cen, axis=1, keepdims=True)
        y = cen * jax.lax.rsqrt(var + eps)
        o_ref[0] = jnp.maximum(y, 0.0).astype(o_ref.dtype)   # ReLU


def upconv_block(x_nchw, w_oihw, b, *, stride, last=False, eps=1e-5):
    """Forward pass of UpConvBlock. x: (N, Cin, H, W); w: (Cout, Cin, ks, ks)."""
    N, Cin, H, W = x_nchw.shape
    Cout, _, ks, _ = w_oihw.shape
    p = stride                                    # Conv2d(..., stride=st, padding=st)
    assert H > p and W > p, "reflect padding requires spatial dims > stride"

    # Reflect pad directly in NCHW (no layout transpose), cast to bf16 for the MXU.
    x_pad = jnp.pad(x_nchw, ((0, 0), (0, 0), (p, p), (p, p)),
                    mode="reflect").astype(jnp.bfloat16)
    Hp, Wp = H + 2 * p, W + 2 * p
    Ho = (Hp - ks) // stride + 1
    Wo = (Wp - ks) // stride + 1
    K = ks * ks * Cin

    # Weight matrix in (ky, kx, ci) contraction order to match the kernel's im2col.
    w_mat = jnp.transpose(w_oihw, (0, 2, 3, 1)).reshape(Cout, K).astype(jnp.bfloat16)

    co = _pick_co_tile(Cout)
    n_co = Cout // co
    cached = n_co > 1

    kern = functools.partial(_conv_block_kernel, ks=ks, st=stride,
                             Ho=Ho, Wo=Wo, eps=eps, last=last, cached=cached)

    in_specs = [
        pl.BlockSpec((1, Cin, Hp, Wp), lambda n, c: (n, 0, 0, 0)),
        pl.BlockSpec((co, K), lambda n, c: (c, 0)),
    ]
    operands = [x_pad, w_mat]
    if last:
        in_specs.append(pl.BlockSpec((co, 1), lambda n, c: (c, 0)))
        operands.append(b.reshape(Cout, 1).astype(jnp.float32))

    scratch_shapes = []
    if cached:
        scratch_shapes.append(pltpu.VMEM((K, Ho * Wo), jnp.bfloat16))

    flops = 2 * N * Cout * K * Ho * Wo
    transcendentals = N * Cout * Ho * Wo if last else N * Cout   # tanh vs rsqrt
    bytes_accessed = (x_pad.size * 2 + w_mat.size * 2
                      + (Cout * 4 if last else 0)
                      + N * Cout * Ho * Wo * 2)

    out = pl.pallas_call(
        kern,
        out_shape=jax.ShapeDtypeStruct((N, Cout, Ho * Wo), jnp.bfloat16),
        grid=(N, n_co),
        in_specs=in_specs,
        out_specs=pl.BlockSpec((1, co, Ho * Wo), lambda n, c: (n, c, 0)),
        scratch_shapes=scratch_shapes,
        compiler_params=pltpu.CompilerParams(
            # Cout axis must be "arbitrary" so one core walks all c-steps for a
            # given n and the cached im2col scratch is always initialized.
            dimension_semantics=("parallel", "arbitrary"),
            # Raise the scoped-VMEM limit above the small per-chip defaults
            # (16 MiB v5e / 32 MiB v6e,v7x) while staying within every chip's
            # physical VMEM (64 MiB on v7x).
            vmem_limit_bytes=64 << 20),
        cost_estimate=pl.CostEstimate(flops=flops,
                                      transcendentals=transcendentals,
                                      bytes_accessed=bytes_accessed),
    )(*operands)

    out = out.reshape(N, Cout, Ho, Wo)            # already NCHW — no transpose
    if last:
        return out
    # UpsamplingNearest2d(scale_factor=2) outside the kernel, in bf16: the kernel
    # writes 1x data and the 4x-sized broadcast stays half-width.
    up = jnp.broadcast_to(out[:, :, :, None, :, None], (N, Cout, Ho, 2, Wo, 2))
    return up.reshape(N, Cout, 2 * Ho, 2 * Wo)


def _reference(x_nchw, w_oihw, b, stride, last=False, eps=1e-5):
    """Pure-JAX f32 reference mirroring the PyTorch module (for verification)."""
    p = stride
    xp = jnp.pad(x_nchw, ((0, 0), (0, 0), (p, p), (p, p)), mode="reflect")
    y = jax.lax.conv_general_dilated(
        xp.astype(jnp.float32), w_oihw.astype(jnp.float32),
        window_strides=(stride, stride), padding="VALID",
        dimension_numbers=("NCHW", "OIHW", "NCHW"))
    y = y + b.astype(jnp.float32)[None, :, None, None]
    if last:
        return jnp.tanh(y)
    mean = y.mean(axis=(2, 3), keepdims=True)
    var = y.var(axis=(2, 3), keepdims=True)
    y = (y - mean) / jnp.sqrt(var + eps)
    y = jnp.maximum(y, 0.0)
    return jnp.repeat(jnp.repeat(y, 2, axis=2), 2, axis=3)


if __name__ == "__main__":
    key = jax.random.PRNGKey(0)
    k1, k2, k3, k4, k5 = jax.random.split(key, 5)

    # Small shapes consistent with the module: UpConvBlock(in_ch=4, out_ch=8, ks=3, st=1)
    N, Cin, H, W = 2, 4, 16, 16
    Cout, ks, st = 8, 3, 1

    x = jax.random.normal(k1, (N, Cin, H, W), jnp.float32)
    w = jax.random.normal(k2, (Cout, Cin, ks, ks), jnp.float32) * 0.1
    b = jax.random.normal(k3, (Cout,), jnp.float32) * 0.1

    # last=False: conv -> instance norm -> relu -> nearest-upsample x2
    out = jax.block_until_ready(upconv_block(x, w, b, stride=st, last=False))
    ref = jax.block_until_ready(_reference(x, w, b, st, last=False))
    assert out.shape == (N, Cout, 2 * H, 2 * W), out.shape
    # bf16 matmul inputs + bf16 output store (f32 accumulation) -> loosened tolerance.
    assert jnp.allclose(out.astype(jnp.float32), ref, atol=5e-2, rtol=5e-2), \
        "mismatch (last=False)"

    # last=True: conv -> tanh   (UpConvBlock(in_ch=4, out_ch=3, ks=3, st=1, last=True))
    Cout2 = 3
    w2 = jax.random.normal(k4, (Cout2, Cin, ks, ks), jnp.float32) * 0.1
    b2 = jax.random.normal(k5, (Cout2,), jnp.float32) * 0.1
    out2 = jax.block_until_ready(upconv_block(x, w2, b2, stride=st, last=True))
    ref2 = jax.block_until_ready(_reference(x, w2, b2, st, last=True))
    assert out2.shape == (N, Cout2, H, W), out2.shape
    assert jnp.allclose(out2.astype(jnp.float32), ref2, atol=5e-2, rtol=5e-2), \
        "mismatch (last=True)"

    print("KERNEL_OK")
</pallas_src>

<mosaic_0001>
module attributes {stable_mosaic.version = 11 : i64} {
  func.func @_conv_block_kernel(%arg0: i32, %arg1: i32, %arg2: memref<1x4x18x18xbf16, #tpu.memory_space<vmem>>, %arg3: memref<8x36xbf16, #tpu.memory_space<vmem>>, %arg4: memref<1x8x256xbf16, #tpu.memory_space<vmem>>) attributes {dimension_semantics = [#tpu.dimension_semantics<parallel>, #tpu.dimension_semantics<arbitrary>], iteration_bounds = array<i64: 2, 1>, scalar_prefetch = 0 : i64, scratch_operands = 0 : i64, tpu.core_type = #tpu.core_type<tc>, window_params = [{transform_indices = @transform_0, window_bounds = array<i64: 1, 4, 18, 18>}, {transform_indices = @transform_1, window_bounds = array<i64: 8, 36>}, {transform_indices = @transform_2, window_bounds = array<i64: 1, 8, 256>}]} {
    %c0 = arith.constant 0 : index
    %c0_0 = arith.constant 0 : index
    %c0_1 = arith.constant 0 : index
    %c0_2 = arith.constant 0 : index
    %0 = vector.load %arg2[%c0, %c0_0, %c0_1, %c0_2] : memref<1x4x18x18xbf16, #tpu.memory_space<vmem>>, vector<1x4x18x18xbf16>
    %1 = vector.shape_cast %0 : vector<1x4x18x18xbf16> to vector<4x18x18xbf16>
    %2 = vector.extract_strided_slice %1 {offsets = [0, 0, 0], sizes = [4, 16, 16], strides = [1, 1, 1]} : vector<4x18x18xbf16> to vector<4x16x16xbf16>
    %3 = vector.extract_strided_slice %1 {offsets = [0, 0, 1], sizes = [4, 16, 16], strides = [1, 1, 1]} : vector<4x18x18xbf16> to vector<4x16x16xbf16>
    %4 = vector.extract_strided_slice %1 {offsets = [0, 0, 2], sizes = [4, 16, 16], strides = [1, 1, 1]} : vector<4x18x18xbf16> to vector<4x16x16xbf16>
    %5 = vector.extract_strided_slice %1 {offsets = [0, 1, 0], sizes = [4, 16, 16], strides = [1, 1, 1]} : vector<4x18x18xbf16> to vector<4x16x16xbf16>
    %6 = vector.extract_strided_slice %1 {offsets = [0, 1, 1], sizes = [4, 16, 16], strides = [1, 1, 1]} : vector<4x18x18xbf16> to vector<4x16x16xbf16>
    %7 = vector.extract_strided_slice %1 {offsets = [0, 1, 2], sizes = [4, 16, 16], strides = [1, 1, 1]} : vector<4x18x18xbf16> to vector<4x16x16xbf16>
    %8 = vector.extract_strided_slice %1 {offsets = [0, 2, 0], sizes = [4, 16, 16], strides = [1, 1, 1]} : vector<4x18x18xbf16> to vector<4x16x16xbf16>
    %9 = vector.extract_strided_slice %1 {offsets = [0, 2, 1], sizes = [4, 16, 16], strides = [1, 1, 1]} : vector<4x18x18xbf16> to vector<4x16x16xbf16>
    %10 = vector.extract_strided_slice %1 {offsets = [0, 2, 2], sizes = [4, 16, 16], strides = [1, 1, 1]} : vector<4x18x18xbf16> to vector<4x16x16xbf16>
    %11 = tpu.concatenate %2, %3, %4, %5, %6, %7, %8, %9, %10 in 0 : vector<4x16x16xbf16>, vector<4x16x16xbf16>, vector<4x16x16xbf16>, vector<4x16x16xbf16>, vector<4x16x16xbf16>, vector<4x16x16xbf16>, vector<4x16x16xbf16>, vector<4x16x16xbf16>, vector<4x16x16xbf16> -> vector<36x16x16xbf16>
    %12 = vector.shape_cast %11 : vector<36x16x16xbf16> to vector<36x256xbf16>
    %c0_3 = arith.constant 0 : index
    %c0_4 = arith.constant 0 : index
    %13 = vector.load %arg3[%c0_3, %c0_4] : memref<8x36xbf16, #tpu.memory_space<vmem>>, vector<8x36xbf16>
    %cst = arith.constant dense<0.000000e+00> : vector<8x256xf32>
    %14 = tpu.matmul %13, %12, %cst {dimension_numbers = #tpu.dot_dimension_numbers<[1], [0], [0], [1], [0, 0, 1, 1], [], []>} : vector<8x36xbf16>, vector<36x256xbf16>, vector<8x256xf32> -> vector<8x256xf32>
    %cst_5 = arith.constant dense<0.000000e+00> : vector<8xf32>
    %15 = vector.multi_reduction <add>, %14, %cst_5 [1] : vector<8x256xf32> to vector<8xf32>
    %16 = vector.shape_cast %15 : vector<8xf32> to vector<8x1xf32>
    %cst_6 = arith.constant 2.560000e+02 : f32
    %17 = vector.broadcast %cst_6 : f32 to vector<8x1xf32>
    %18 = arith.divf %16, %17 : vector<8x1xf32>
    %19 = vector.broadcast %18 : vector<8x1xf32> to vector<8x256xf32>
    %20 = arith.subf %14, %19 : vector<8x256xf32>
    %21 = arith.mulf %20, %20 : vector<8x256xf32>
    %cst_7 = arith.constant dense<0.000000e+00> : vector<8xf32>
    %22 = vector.multi_reduction <add>, %21, %cst_7 [1] : vector<8x256xf32> to vector<8xf32>
    %23 = vector.shape_cast %22 : vector<8xf32> to vector<8x1xf32>
    %cst_8 = arith.constant 2.560000e+02 : f32
    %24 = vector.broadcast %cst_8 : f32 to vector<8x1xf32>
    %25 = arith.divf %23, %24 : vector<8x1xf32>
    %cst_9 = arith.constant 9.99999974E-6 : f32
    %26 = vector.broadcast %cst_9 : f32 to vector<8x1xf32>
    %27 = arith.addf %25, %26 : vector<8x1xf32>
    %28 = math.rsqrt %27 : vector<8x1xf32>
    %29 = vector.broadcast %28 : vector<8x1xf32> to vector<8x256xf32>
    %30 = arith.mulf %20, %29 : vector<8x256xf32>
    %cst_10 = arith.constant 0.000000e+00 : f32
    %31 = vector.broadcast %cst_10 : f32 to vector<8x256xf32>
    %32 = arith.maximumf %30, %31 : vector<8x256xf32>
    %33 = arith.truncf %32 : vector<8x256xf32> to vector<8x256xbf16>
    %c0_11 = arith.constant 0 : index
    %c0_12 = arith.constant 0 : index
    %c0_13 = arith.constant 0 : index
    %34 = vector.load %arg4[%c0_11, %c0_12, %c0_13] : memref<1x8x256xbf16, #tpu.memory_space<vmem>>, vector<1x8x256xbf16>
    %35 = vector.shape_cast %34 : vector<1x8x256xbf16> to vector<8x256xbf16>
    %36 = vector.shape_cast %33 : vector<8x256xbf16> to vector<1x8x256xbf16>
    tpu.vector_store %arg4[%c0_11, %c0_12, %c0_13], %36 {strides = array<i32>} : memref<1x8x256xbf16, #tpu.memory_space<vmem>>, vector<1x8x256xbf16>,
    return
  }
  func.func @transform_0(%arg0: i32, %arg1: i32) -> (i32, i32, i32, i32) {
    %c0_i32 = arith.constant 0 : i32
    %c0_i32_0 = arith.constant 0 : i32
    %c0_i32_1 = arith.constant 0 : i32
    %c0_i32_2 = arith.constant 0 : i32
    return %arg0, %c0_i32, %c0_i32_0, %c0_i32_1 : i32, i32, i32, i32
  }
  func.func @transform_1(%arg0: i32, %arg1: i32) -> (i32, i32) {
    %c0_i32 = arith.constant 0 : i32
    %c0_i32_0 = arith.constant 0 : i32
    return %arg1, %c0_i32 : i32, i32
  }
  func.func @transform_2(%arg0: i32, %arg1: i32) -> (i32, i32, i32) {
    %c0_i32 = arith.constant 0 : i32
    %c0_i32_0 = arith.constant 0 : i32
    return %arg0, %arg1, %c0_i32 : i32, i32, i32
  }
}

</mosaic_0001>

<bundles_post_ra>
// kernel: tpu_custom_call.1
= control target key start
LH: loop header
LB: loop body
LE: loop exit
PB: predicated region body
PF: predicated region fallthrough
CT: control target
= control target key end

     0   :  { %7 = vsyncpa [#allocation3], 0  ;;  %s3206_s0 = inlined_call_operand.vmem [shape: bf16[2,4,18,18], index: 0, kind: input, shape index: {}]   ;;  %s3207_s1 = inlined_call_operand.vmem [shape: bf16[8,36], index: 1, kind: input, shape index: {}]   ;;  %s3208_s2 = inlined_call_operand.hbm [shape: bf16[2,8,256], index: 2, kind: output, shape index: {}]  }
   0x1   :  { %9 = vsyncpa [#allocation3 + $0x1], 0  ;;  %s2009_s9 = smov 0   ;;  %s2011_s10 = smov 0  }
   0x2   :  { %s2013_s11 = smov 0   ;;  %s2015_s12 = smov 0  }
   0x3   :  { %s2017_s13 = smov 0   ;;  %s2019_s14 = smov 0  }
   0x4 LB: > { %s1810_s15 = sadd.s32 4294967295, %s1980_s14   ;;  %s1811_s16 = sadd.s32 4294967294, %s1980_s14   ;;  %s1980_s14 = sphi %s2019_s14, %s15_s14   ;;  %s1976_s13 = sphi %s2017_s13, %s3283_s13   ;;  %s1972_s12 = sphi %s2015_s12, %s3282_s12   ;;  %s1968_s11 = sphi %s2013_s11, %s3281_s11   ;;  %s1964_s10 = sphi %s2011_s10, %s3280_s10   ;;  %s1960_s9 = sphi %s2009_s9, %s3279_s9  }
   0x5   : > { %s27_s17 = sadd.s32 1, %s1976_s13  ;;  %s88_s18 = sadd.s32 1, %s1968_s11 }
   0x6   : > { %p29_p0 = scmp.ge.s32.totalorder %s27_s17, 2  ;;  %p98_p1 = scmp.ne.s32.totalorder %s1968_s11, %s1964_s10 }
   0x7   : > { %p99_p2 = scmp.eq.s32.totalorder %s1810_s15, 1  ;;  %p104_p3 = scmp.ne.s32.totalorder %s1964_s10, %s1960_s9 }
   0x8   : > { %s3285_s17 = smov (%p29_p0, %s27_s17), 0  ;;  %p105_p5 = scmp.eq.s32.totalorder %s1811_s16, 1 }
   0x9   : > { %p2049_p4 = por %p99_p2, %p98_p1  ;;  %s83_s20 = ssub.s32 %s1976_s13, %s3285_s17 }
   0xa   : > { %p1815_p6 = scmp.ge.s32.totalorder %s1980_s14, 1  ;;  %p86_p7 = scmp.eq.s32.totalorder %s83_s20, 0 }
   0xb   : > { %p2056_p8 = por %p105_p5, %p104_p3  ;;  %p138_p9 = scmp.lt.s32.totalorder %s1980_s14, 3 }
   0xc   : > { %s2062_s22 = scalar_select %p86_p7, %s1968_s11, %s88_s18  }
   0xd   : > { %p139_p10 = pnand %p1815_p6, %p138_p9 }
   0xf   : > { %142 = sbr.rel (%p139_p10) target bundleno = 851 (0x353), region = 28 }
  0x14   : > { %p164_p11 = scmp.lt.s32.totalorder %s1972_s12, 1  ;;  %vm361_vm0 = vcmask 1042432   ;;  %vm362_vm1 = vcmask 1046532   ;;  %s1982_s28 = smov 126   ;;  %vm226_vm3 = vsmask.f32 3328 }
  0x15   : > { %vm2071_vm2 = vmor %vm361_vm0, %vm362_vm1  ;;  %s1983_s29 = smov 127   ;;  %vm227_vm4 = vsmask.f32 7440  ;;  %vm689_vm6 = vcmask 1047556   ;;  %s1986_s30 = smov 64   ;;  %vm1533_vm7 = vcmask 130048  }
  0x16   : > { %s165_s23 = scalar_select %p164_p11, %s1972_s12, 1  ;;  %vm2164_vm5 = vmor %vm226_vm3, %vm227_vm4  ;;  %vm1543_vm8 = vcmask 261120   ;;  %vm1550_vm9 = vcmask 392192   ;;  %vm1557_vm10 = vcmask 523264   ;;  %vm1564_vm11 = vcmask 654336  }
  0x17   : > { %s1987_s3 = smov 80   ;;  %s1988_s4 = smov 16   ;;  %vm1571_vm12 = vcmask 785408   ;;  %vm1578_vm13 = vcmask 916480   ;;  %vm1639_vm14 = vcmask 1041408   ;;  %vm1635_vm15 = vcmask 293888  }
  0x18   : > { %s1830_s24 = smul.u32 48, %s165_s23  ;;  %s1989_s5 = smov 32  }
  0x19   : > { %s1990_s6 = smov 48   ;;  %s1991_s7 = smov 96  }
  0x1a   : > { %s2069_s27 = scalar_lea.vmem %s3206_s0, %s1830_s24  ;;  %s1992_s8 = smov 112  }
  0x1b   : > { %v2076_v1 = vld [vmem:[%s2069_s27 + $0x24] sm:$0xf]  ;;  %v2079_v2 = vld [vmem:[%s2069_s27 + $0x28] sm:$0xf]  ;;  %v2082_v3 = vld [vmem:[%s2069_s27 + $0x18] sm:$0xf] }
  0x1c   : > { %v1821_v4 = vrot.slane %v2076_v1, 9  ;;  %v387_v5 = vrot.slane %v2079_v2, 5  ;;  %v2087_v6 = vld [vmem:[%s2069_s27 + $0x1c] sm:$0xf]  ;;  %v1820_v7 = vrot.slane %v2082_v3, 9  ;;  %v311_v8 = vshll.u32 %v2079_v2, 16 }
  0x1d   : > { %v380_v9 = vrot.slane %v2087_v6, 5  ;;  %v185_v10 = vld [vmem:[%s2069_s27 + $0x2c] sm:$0x1]  ;;  %v2094_v11 = vld [vmem:[%s2069_s27 + $0x20] sm:$0x1]  ;;  %v3215_v12 = vshrl.u32 %v2079_v2, 16 }
  0x1e   : > { %v2099_v13 = vsel %vm2071_vm2, %v1821_v4, %v387_v5  ;;  %v389_v14 = vrot.slane %v387_v5, 4  ;;  %v390_v15 = vrot.slane %v185_v10, 5  ;;  %v383_v16 = vrot.slane %v2094_v11, 5  ;;  %v2134_v32 = vld [vmem:[%s2069_s27 + $0x4] sm:$0xf]  ;;  %s161_s18 = sand.u32 1, %s1964_s10  }
  0x1f   : > { %420 = vrot.lane.b32.xlu1 %v2099_v13, %s1982_s28  ;;  %v525_v17 = vshrl.u32 %v2099_v13, 16  ;;  %v2107_v18 = vsel %vm2071_vm2, %v1820_v7, %v380_v9  ;;  %v382_v19 = vrot.slane %v380_v9, 4  ;;  %v313_v20 = vrot.slane %v311_v8, 5  ;;  %v2141_v37 = vld [vmem:[%s2069_s27 + $0x8] sm:$0x1]  ;;  %s1816_s20 = sshll.u32 %s161_s18, 3 }
  0x20   : > { %416 = vrot.lane.b32.xlu0 %v2107_v18, %s1982_s28  ;;  %v522_v21 = vpack.i.b16 %v2099_v13, %v2107_v18  ;;  %v524_v22 = vshrl.u32 %v2107_v18, 16  ;;  %v2116_v23 = vsel %vm2071_vm2, %v389_v14, %v390_v15  ;;  %v317_v24 = vrot.slane %v3215_v12, 4  ;;  %400 = vrot.lane.b32.xlu2 %v2107_v18, %s1983_s29  ;;  %v2151_v44 = vld [vmem:[%s2069_s27 + $0x10] sm:$0xf]  ;;  %v2157_v51 = vld [vmem:[%s2069_s27] sm:$0xf] }
  0x21   : > { %v657_v25 = vshrl.u32 %v2116_v23, 16  ;;  %v2125_v26 = vsel %vm2071_vm2, %v382_v19, %v383_v16  ;;  %v3213_v27 = vshrl.u32 %v2076_v1, 16  ;;  %v321_v31 = vshll.u32 %v185_v10, 16  ;;  %v2170_v57 = vld [vmem:[%s2069_s27 + $0x14] sm:$0x1]  ;;  %s1829_s23 = sshll.u32 %s1972_s12, 3 }
  0x22   : > { %v2128_v28 = vpack.i.b16 %v525_v17, %v524_v22  ;;  %v654_v29 = vpack.i.b16 %v2116_v23, %v2125_v26  ;;  %v656_v30 = vshrl.u32 %v2125_v26, 16  ;;  %v318_v33 = vor.u32 %v317_v24, %v313_v20  ;;  %s1720_s26 = scalar_lea.hbm %s3208_s2, %s1829_s23  ;;  %s1707_s12 = scalar_lea.sflag [#allocation3], %s161_s18 }
  0x23   : > { %v304_v34 = vrot.slane %v3213_v27, 4  ;;  %v305_v35 = vshll.u32 %v2076_v1, 16  ;;  %v3214_v36 = vshrl.u32 %v2082_v3, 16  ;;  %v281_v39 = vshll.u32 %v2082_v3, 16 }
  0x24   : > { %v2143_v38 = vpack.i.b16 %v657_v25, %v656_v30  ;;  %v287_v40 = vshll.u32 %v2087_v6, 16  ;;  %v366_v43 = vrot.slane %v2134_v32, 5  ;;  %v323_v45 = vrot.slane %v321_v31, 5 }
  0x25   : > { %v307_v41 = vrot.slane %v305_v35, 5  ;;  %v280_v42 = vrot.slane %v3214_v36, 4  ;;  %v283_v46 = vrot.slane %v281_v39, 5  ;;  %v369_v47 = vrot.slane %v2141_v37, 5 }
  0x26   : > { %v319_v48 = vrot.slane %v318_v33, 4  ;;  %v368_v50 = vrot.slane %v366_v43, 4  ;;  %v3216_v52 = vshrl.u32 %v2087_v6, 16  ;;  %v289_v55 = vrot.slane %v287_v40, 5 }
  0x27   : > { %422 = vrot.lane.b32.xlu1 %v2116_v23, %s1982_s28  ;;  %v308_v49 = vor.u32 %v307_v41, %v304_v34  ;;  %v284_v54 = vor.u32 %v283_v46, %v280_v42  ;;  %v297_v56 = vshll.u32 %v2094_v11, 16  ;;  %v373_v58 = vrot.slane %v2151_v44, 5  ;;  %v2221_v34 = vld [vmem:[%s2069_s27 + $0xc] sm:$0xf]  ;;  %s163_s27 = scalar_lea.vmem [#allocation2], %s1816_s20 }
  0x28   : > { %418 = vrot.lane.b32.xlu0 %v2125_v26, %s1982_s28  ;;  %v293_v60 = vrot.slane %v3216_v52, 4  ;;  %v2177_v62 = vsel %vm2071_vm2, %v368_v50, %v369_v47  ;;  %v1818_v63 = vrot.slane %v2157_v51, 9  ;;  %v376_v9 = vrot.slane %v2170_v57, 5 }
  0x29   : > { %v309_v59 = vrot.slane %v308_v49, 4  ;;  %v285_v61 = vrot.slane %v284_v54, 4  ;;  %v375_v4 = vrot.slane %v373_v58, 4  ;;  %v299_v8 = vrot.slane %v297_v56, 5 }
  0x2a   : > { %v294_v7 = vor.u32 %v293_v60, %v289_v55  ;;  %v2187_v10 = vsel %vm2164_vm5, %v319_v48, %v323_v45  ;;  %v648_v15 = vshrl.u32 %v2177_v62, 16  ;;  %v2214_v31 = vsel %vm2071_vm2, %v1818_v63, %v366_v43 }
  0x2b   : > { %v2182_v5 = vsel %vm2164_vm5, %v309_v59, %v313_v20  ;;  %v2192_v14 = vsel %vm2164_vm5, %v285_v61, %v289_v55  ;;  %v2202_v20 = vsel %vm2071_vm2, %v375_v4, %v376_v9  ;;  %v609_v22 = vshrl.u32 %v2187_v10, 16 }
  0x2c   : > { %v477_v11 = vshrl.u32 %v2182_v5, 16  ;;  %349 = vrot.lane.b32.xlu2 %v2192_v14, %s1982_s28  ;;  %v474_v16 = vpack.i.b16 %v2182_v5, %v2192_v14  ;;  %v476_v17 = vshrl.u32 %v2192_v14, 16  ;;  %v295_v19 = vrot.slane %v294_v7, 4 }
  0x2d   : > { %v649_v25 = vshrl.u32 %v2202_v20, 16  ;;  %v1819_v41 = vrot.slane %v2221_v34, 9  ;;  %v516_v42 = vshrl.u32 %v2214_v31, 16  ;;  %v3211_v49 = vshrl.u32 %v2221_v34, 16 }
  0x2e   : > { %v2210_v30 = vpack.i.b16 %v477_v11, %v476_v17  ;;  %v2218_v33 = vsel %vm2164_vm5, %v295_v19, %v299_v8  ;;  %v257_v50 = vshll.u32 %v2221_v34, 16  ;;  %v263_v55 = vshll.u32 %v2151_v44, 16 }
  0x2f   : > { %355 = vrot.lane.b32.xlu1 %v2187_v10, %s1982_s28  ;;  %v608_v39 = vshrl.u32 %v2218_v33, 16  ;;  %v2228_v40 = vpack.i.b16 %v649_v25, %v648_v15  ;;  %v2236_v45 = vsel %vm2071_vm2, %v1819_v41, %v373_v58  ;;  %v256_v0 = vrot.slane %v3211_v49, 4 }
  0x30   : > { %353 = vrot.lane.b32.xlu0 %v2182_v5, %s1982_s28  ;;  %v517_v47 = vshrl.u32 %v2236_v45, 16  ;;  %v259_v54 = vrot.slane %v257_v50, 5  ;;  %v239_v56 = vshll.u32 %v2134_v32, 16  ;;  %v3210_v59 = vshrl.u32 %v2134_v32, 16 }
  0x31   : > { %v2232_v43 = vpack.i.b16 %v609_v22, %v608_v39  ;;  %v3212_v60 = vshrl.u32 %v2157_v51, 16  ;;  %v233_v61 = vshll.u32 %v2157_v51, 16  ;;  %v265_v63 = vrot.slane %v263_v55, 5 }
  0x32   : > { %v2243_v48 = vpack.i.b16 %v517_v47, %v516_v42  ;;  %v260_v58 = vor.u32 %v259_v54, %v256_v0  ;;  %v241_v4 = vrot.slane %v239_v56, 5  ;;  %v245_v8 = vrot.slane %v3210_v59, 4 }
  0x33   : > { %v232_v9 = vrot.slane %v3212_v60, 4  ;;  %v235_v11 = vrot.slane %v233_v61, 5  ;;  %v249_v22 = vshll.u32 %v2141_v37, 16  ;;  %v3209_v42 = vshrl.u32 %v2151_v44, 16 }
  0x34   : > { %351 = vrot.lane.b32.xlu2 %v2218_v33, %s1982_s28  ;;  %v261_v7 = vrot.slane %v260_v58, 4  ;;  %v246_v19 = vor.u32 %v245_v8, %v241_v4  ;;  %v273_v58 = vshll.u32 %v2170_v57, 16  ;;  %v1984_v24 = vmov 1983009808  }
  0x35   : > { %v236_v15 = vor.u32 %v235_v11, %v232_v9  ;;  %v251_v0 = vrot.slane %v249_v22, 5  ;;  %v269_v54 = vrot.slane %v3209_v42, 4  ;;  %v692_v27 = vunpack.c.l.s4 %v1984_v24 }
  0x36   : > { %v2272_v17 = vsel %vm2164_vm5, %v261_v7, %v265_v63  ;;  %v247_v50 = vrot.slane %v246_v19, 4  ;;  %v275_v7 = vrot.slane %v273_v58, 5 }
  0x37   : > { %404 = vrot.lane.b32.xlu1 %v2099_v13, %s1983_s29  ;;  %v237_v25 = vrot.slane %v236_v15, 4  ;;  %v469_v39 = vshrl.u32 %v2272_v17, 16  ;;  %v270_v56 = vor.u32 %v269_v54, %v265_v63 }
  0x38   : > { %402 = vrot.lane.b32.xlu0 %v2125_v26, %s1983_s29  ;;  %v2295_v61 = vsel %vm2164_vm5, %v247_v50, %v251_v0 }
  0x39   : > { %v2280_v41 = vsel %vm2164_vm5, %v237_v25, %v241_v4  ;;  %v271_v4 = vrot.slane %v270_v56, 4  ;;  %v600_v8 = vshrl.u32 %v2295_v61, 16 }
  0x3a   : > { %v468_v37 = vshrl.u32 %v2280_v41, 16 }
  0x3b   : > { %v2304_v9 = vsel %vm2164_vm5, %v271_v4, %v275_v7 }
  0x3c   : > { %406 = vrot.lane.b32.xlu2 %v2116_v23, %s1983_s29  ;;  %v2290_v55 = vpack.i.b16 %v469_v39, %v468_v37  ;;  %v601_v63 = vshrl.u32 %v2304_v9, 16 }
  0x3e   : > { %v2311_v11 = vpack.i.b16 %v601_v63, %v600_v8  ;;  %v2401_v63 = vunpack.c.0.s8 %v692_v27 }
  0x3f   : > { %410 = vrot.lane.b32.xlu1 %v2177_v62, %s1982_s28 }
  0x40   : > { %408 = vrot.lane.b32.xlu0 %v2214_v31, %s1982_s28  ;;  %3228 = vst [vmem:[#allocation5_spill] sm:$0xff] %v2311_v11 }
  0x44   : > { %412 = vrot.lane.b32.xlu2 %v2236_v45, %s1982_s28 }
  0x47   : > { %333 = vrot.lane.b32.xlu1 %v2192_v14, %s1983_s29 }
  0x48   : > { %414 = vrot.lane.b32.xlu0 %v2202_v20, %s1982_s28 }
  0x4c   : > { %335 = vrot.lane.b32.xlu2 %v2218_v33, %s1983_s29 }
  0x4f   : > { %339 = vrot.lane.b32.xlu1 %v2187_v10, %s1983_s29 }
  0x50   : > { %337 = vrot.lane.b32.xlu0 %v2182_v5, %s1983_s29 }
  0x54   : > { %341 = vrot.lane.b32.xlu2 %v2280_v41, %s1982_s28 }
  0x57   : > { %345 = vrot.lane.b32.xlu1 %v2272_v17, %s1982_s28 }
  0x58   : > { %343 = vrot.lane.b32.xlu0 %v2295_v61, %s1982_s28 }
  0x5c   : > { %347 = vrot.lane.b32.xlu2 %v2304_v9, %s1982_s28 }
  0x5f   : > { %394 = vrot.lane.b32.xlu1 %v2177_v62, %s1983_s29 }
  0x60   : > { %392 = vrot.lane.b32.xlu0 %v2214_v31, %s1983_s29 }
  0x64   : > { %396 = vrot.lane.b32.xlu2 %v2236_v45, %s1983_s29 }
  0x67   : > { %202 = vrot.lane.b32.xlu1 %v2082_v3, %s1983_s29 }
  0x68   : > { %398 = vrot.lane.b32.xlu0 %v2202_v20, %s1983_s29 }
  0x6c   : > { %204 = vrot.lane.b32.xlu2 %v2087_v6, %s1983_s29 }
  0x6f   : > { %208 = vrot.lane.b32.xlu1 %v2079_v2, %s1983_s29 }
  0x70   : > { %206 = vrot.lane.b32.xlu0 %v2076_v1, %s1983_s29 }
  0x74   : > { %325 = vrot.lane.b32.xlu2 %v2280_v41, %s1983_s29 }
  0x77   : > { %329 = vrot.lane.b32.xlu1 %v2272_v17, %s1983_s29 }
  0x78   : > { %327 = vrot.lane.b32.xlu0 %v2295_v61, %s1983_s29 }
  0x7a   : > { %v401_v53 = vpop.permute.xlu2 %400 }
  0x7b   : > { %v540_v12 = vshrl.u32 %v401_v53, 16 }
  0x7c   : > { %331 = vrot.lane.b32.xlu2 %v2304_v9, %s1983_s29 }
  0x7f   : > { %196 = vrot.lane.b32.xlu1 %v2134_v32, %s1983_s29 }
  0x80   : > { %194 = vrot.lane.b32.xlu0 %v2157_v51, %s1983_s29 }
  0x84   : > { %198 = vrot.lane.b32.xlu2 %v2221_v34, %s1983_s29 }
  0x86   : > { %v2353_v15 = vpop.permute.xlu2 %349 }
  0x87   : > { %218 = vrot.lane.b32.xlu1 %v2082_v3, %s1982_s28  ;;  %v508_v56 = vshrl.u32 %v2353_v15, 16 }
  0x88   : > { %200 = vrot.lane.b32.xlu0 %v2151_v44, %s1983_s29  ;;  %s1724_s29 = sshll.u32 %s1720_s26, 4  ;;  %s1725_s29 = int_to_ptr.hbm [resolvable:$true] %s1724_s29 }
  0x8c   : > { %220 = vrot.lane.b32.xlu2 %v2087_v6, %s1982_s28 }
  0x8e   : > { %v2361_v19 = vpop.permute.xlu2 %351 }
  0x8f   : > { %224 = vrot.lane.b32.xlu1 %v2079_v2, %s1982_s28  ;;  %v640_v54 = vshrl.u32 %v2361_v19, 16 }
  0x90   : > { %222 = vrot.lane.b32.xlu0 %v2076_v1, %s1982_s28 }
  0x91   : > { %v421_v22 = vpop.permute.xlu1 %420 }
  0x92   : > { %v417_v25 = vpop.permute.xlu0 %416 }
  0x93   : > { %v553_v47 = vshrl.u32 %v417_v25, 16 }
  0x94   : > { %210 = vrot.lane.b32.xlu2 %v2157_v51, %s1982_s28 }
  0x96   : > { %v2369_v39 = vpop.permute.xlu2 %406 }
  0x97   : > { %214 = vrot.lane.b32.xlu1 %v2221_v34, %s1982_s28 }
  0x98   : > { %212 = vrot.lane.b32.xlu0 %v2134_v32, %s1982_s28 }
  0x99   : > { %v2373_v37 = vpop.permute.xlu1 %422 }
  0x9a   : > { %v2375_v50 = vpop.permute.xlu0 %418 }
  0x9b   : > { %v685_v23 = vshrl.u32 %v2375_v50, 16 }
  0x9c   : > { %216 = vrot.lane.b32.xlu2 %v2151_v44, %s1982_s28  ;;  %s1722_s28 = sshll.u32 %s163_s27, 4  ;;  %s1723_s28 = int_to_ptr.vmem [resolvable:$true] %s1722_s28 }
  0x9e   : > { %v413_v0 = vpop.permute.xlu2 %412 }
  0xa1   : > { %v2381_v58 = vpop.permute.xlu1 %355 }
  0xa2   : > { %v641_v4 = vshrl.u32 %v2381_v58, 16  ;;  %v2384_v7 = vpop.permute.xlu0 %353 }
  0xa3   : > { %v509_v42 = vshrl.u32 %v2384_v7, 16 }
  0xa4   : > { %v2391_v59 = vpack.i.b16 %v641_v4, %v640_v54  ;;  %v552_v54 = vpack.i.b16 %v421_v22, %v417_v25  ;;  %v686_v25 = vshrl.u32 %v2373_v37, 16 }
  0xa5   : > { %v2393_v49 = vpack.i.b16 %v509_v42, %v508_v56  ;;  %v554_v56 = vshrl.u32 %v421_v22, 16 }
  0xa6   : > { %v2395_v60 = vpop.permute.xlu2 %335 }
  0xa7   : > { %v555_v18 = vpack.i.b16 %v554_v56, %v553_v47  ;;  %v687_v56 = vpack.i.b16 %v686_v25, %v685_v23 }
  0xa9   : > { %v405_v36 = vpop.permute.xlu1 %404 }
  0xaa   : > { %v538_v52 = vpack.i.b16 %v405_v36, %v401_v53  ;;  %v541_v46 = vshrl.u32 %v405_v36, 16  ;;  %v2397_v57 = vpop.permute.xlu0 %402 }
  0xab   : > { %v670_v8 = vpack.i.b16 %v2369_v39, %v2397_v57 }
  0xac   : > { %v542_v4 = vpack.i.b16 %v541_v46, %v540_v12  ;;  %v863_v42 = vrot.slane %v538_v52, 4  ;;  %v922_v12 = vperm.slane %v552_v54, %v2401_v63  ;;  %v1985_v46 = vmov 1934713408  }
  0xad   : > { %v1139_v35 = vrot.slane %v670_v8, 4  ;;  %v706_v13 = vunpack.c.l.s4 %v1985_v46  ;;  %v948_v54 = vperm.slane %v555_v18, %v2401_v63 }
  0xae   : > { %v2407_v24 = vsel %vm689_vm6, %v863_v42, %v522_v21  ;;  %v891_v36 = vrot.slane %v542_v4, 4  ;;  %v2415_v27 = vpop.permute.xlu2 %341  ;;  %v548_v21 = vshrl.u32 %v413_v0, 16  ;;  %v923_v8 = vrot.slane %v922_v12, 4 }
  0xaf   : > { %v2413_v53 = vsel %vm689_vm6, %v1139_v35, %v654_v29  ;;  %v2424_v4 = vunpack.c.0.s8 %v706_v13  ;;  %v949_v14 = vrot.slane %v948_v54, 4 }
  0xb0   : > { %v2420_v52 = vsel %vm689_vm6, %v891_v36, %v2128_v28  ;;  %v684_v28 = vpack.i.b16 %v2373_v37, %v2375_v50  ;;  %v2433_v36 = vrot.slane %v474_v16, 4  ;;  %v3229_v37 = vpack.i.b16 %v2187_v10, %v2218_v33 }
  0xb1   : > { %v411_v22 = vpop.permute.xlu1 %410  ;;  %v2459_v10 = vperm.slane %v687_v56, %v2401_v63  ;;  %v2523_v11 = vperm.slane %v2413_v53, %v2401_v63 }
  0xb2   : > { %v409_v26 = vpop.permute.xlu0 %408  ;;  %v2443_v50 = vrot.slane %v3229_v37, 4  ;;  %v1198_v16 = vperm.slane %v684_v28, %v2401_v63  ;;  %v679_v33 = vshrl.u32 %v411_v22, 16 }
  0xb3   : > { %v546_v29 = vpack.i.b16 %v413_v0, %v409_v26  ;;  %v547_v35 = vshrl.u32 %v409_v26, 16 }
  0xb5   : > { %v549_v42 = vpack.i.b16 %v548_v21, %v547_v35  ;;  %v917_v47 = vperm.slane %v546_v29, %v2401_v63  ;;  %v3231_v35 = vpack.i.b16 %v2272_v17, %v2280_v41 }
  0xb6   : > { %v2437_v26 = vpop.permute.xlu2 %347 }
  0xb7   : > { %v924_v0 = vsel %vm689_vm6, %v923_v8, %v917_v47  ;;  %v925_v46 = vrot.slane %v917_v47, 4  ;;  %v943_v13 = vperm.slane %v549_v42, %v2401_v63  ;;  %v2456_v8 = vrot.slane %v3231_v35, 4 }
  0xb8   : > { %v2447_v5 = vperm.slane %v924_v0, %v2424_v4  ;;  %v672_v35 = vshrl.u32 %v2397_v57, 16  ;;  %v3232_v57 = vpack.i.b16 %v2304_v9, %v2295_v61  ;;  %v3234_v9 = vpack.i.b16 %v2384_v7, %v2353_v15 }
  0xb9   : > { %v951_v25 = vrot.slane %v943_v13, 4  ;;  %v2450_v23 = vpop.permute.xlu1 %333  ;;  %v926_v29 = vsel %vm689_vm6, %v922_v12, %v925_v46  ;;  %v950_v18 = vsel %vm689_vm6, %v949_v14, %v943_v13  ;;  %v673_v12 = vshrl.u32 %v2369_v39, 16 }
  0xba   : > { %3230 = vst [vmem:[#allocation6_spill] sm:$0xff] %v2447_v5  ;;  %v415_v42 = vpop.permute.xlu0 %414  ;;  %v2462_v47 = vperm.slane %v926_v29, %v2424_v4  ;;  %v935_v56 = vrot.slane %v2447_v5, 4  ;;  %v1199_v46 = vrot.slane %v1198_v16, 4  ;;  %v956_v39 = vperm.slane %v950_v18, %v2424_v4 }
  0xbb   : > { %v678_v0 = vpack.i.b16 %v415_v42, %v411_v22  ;;  %v680_v28 = vshrl.u32 %v415_v42, 16  ;;  %v952_v37 = vsel %vm689_vm6, %v948_v54, %v951_v25  ;;  %v1225_v14 = vrot.slane %v2459_v10, 4 }
  0xbc   : > { %v1320_v17 = vunpack.c.l.b16 %v2462_v47  ;;  %v2469_v41 = vperm.slane %v952_v37, %v2424_v4  ;;  %v936_v18 = vsel %vm689_vm6, 0, %v935_v56 }
  0xbd   : > { %v681_v29 = vpack.i.b16 %v680_v28, %v679_v33  ;;  %v1193_v22 = vperm.slane %v678_v0, %v2401_v63  ;;  %v2487_v33 = vrot.slane %v3232_v57, 4  ;;  %v807_v57 = vrot.slane %v3234_v9, 4 }
  0xbe   : > { %v1323_v54 = vpack.c.b16 %v1320_v17, %v1320_v17  ;;  %v1339_v13 = vunpack.c.l.b16 %v2469_v41  ;;  %v2482_v5 = vpop.permute.xlu2 %396  ;;  %v835_v9 = vrot.slane %v2393_v49, 4  ;;  %v492_v17 = vshrl.u32 %v2450_v23, 16 }
  0xbf   : > { %v1200_v25 = vsel %vm689_vm6, %v1199_v46, %v1193_v22  ;;  %v1201_v37 = vrot.slane %v1193_v22, 4  ;;  %v2480_v21 = vperm.slane %v681_v29, %v2401_v63  ;;  %v674_v46 = vpack.i.b16 %v673_v12, %v672_v35 }
  0xc0   : > { %1328 = vrot.lane.b32.xlu0 %v1323_v54, %s1986_s30  ;;  %v1342_v0 = vpack.c.b16 %v1339_v13, %v1339_v13  ;;  %v2492_v28 = vperm.slane %v1200_v25, %v2424_v4  ;;  %v3235_v54 = vpack.i.b16 %v2381_v58, %v2361_v19  ;;  %v1263_v25 = vunpack.c.l.b16 %v956_v39 }
  0xc1   : > { %v340_v29 = vpop.permute.xlu1 %339  ;;  %v1202_v22 = vsel %vm689_vm6, %v1198_v16, %v1201_v37  ;;  %v1226_v61 = vsel %vm689_vm6, %v1225_v14, %v2480_v21  ;;  %v1111_v16 = vrot.slane %v2391_v59, 4  ;;  %v624_v35 = vshrl.u32 %v2395_v60, 16 }
  0xc2   : > { %3233 = vst [vmem:[#allocation7_spill] sm:$0xff] %v2492_v28  ;;  %v1083_v56 = vrot.slane %v3235_v54, 4  ;;  %v338_v13 = vpop.permute.xlu0 %337  ;;  %1347 = vrot.lane.b32.xlu2 %v1342_v0, %s1987_s3  ;;  %v2506_v12 = vperm.slane %v1202_v22, %v2424_v4  ;;  %v1282_v14 = vunpack.c.l.b16 %v936_v18  ;;  %v1211_v15 = vrot.slane %v2492_v28, 4 }
  0xc3   : > { %v625_v7 = vshrl.u32 %v340_v29, 16  ;;  %v493_v37 = vshrl.u32 %v338_v13, 16  ;;  %v1232_v58 = vperm.slane %v1226_v61, %v2424_v4  ;;  %v1167_v0 = vrot.slane %v674_v46, 4 }
  0xc4   : > { %v1466_v19 = vunpack.c.l.b16 %v2506_v12  ;;  %v622_v54 = vpack.i.b16 %v340_v29, %v2395_v60  ;;  %v961_v22 = vrot.slane %v956_v39, 4  ;;  %v490_v59 = vpack.i.b16 %v338_v13, %v2450_v23 }
  0xc5   : > { %v1266_v42 = vpack.c.b16 %v1263_v25, %v1263_v25  ;;  %v2519_v28 = vperm.slane %v2407_v24, %v2401_v63  ;;  %v1227_v49 = vrot.slane %v2480_v21, 4  ;;  %v1212_v46 = vsel %vm689_vm6, 0, %v1211_v15 }
  0xc6   : > { %v1469_v18 = vpack.c.b16 %v1466_v19, %v1466_v19  ;;  %v2527_v60 = vpop.permute.xlu2 %204  ;;  %v626_v39 = vpack.i.b16 %v625_v7, %v624_v35  ;;  %v494_v29 = vpack.i.b16 %v493_v37, %v492_v17  ;;  %v1285_v23 = vpack.c.b16 %v1282_v14, %v1282_v14 }
  0xc7   : > { %v1237_v24 = vrot.slane %v1232_v58, 4  ;;  %v1168_v61 = vsel %vm689_vm6, %v1167_v0, %v2143_v38  ;;  %v1084_v53 = vsel %vm689_vm6, %v1083_v56, %v622_v54  ;;  %v500_v21 = vshrl.u32 %v2415_v27, 16 }
  0xc8   : > { %1271 = vrot.lane.b32.xlu0 %v1266_v42, %s1988_s4  ;;  %1474 = vrot.lane.b32.xlu1 %v1469_v18, %s1986_s30  ;;  %v962_v25 = vsel %vm689_vm6, 0, %v961_v22  ;;  %v808_v35 = vsel %vm689_vm6, %v807_v57, %v490_v59  ;;  %v1409_v42 = vunpack.c.l.b16 %v1232_v58  ;;  %v1428_v15 = vunpack.c.l.b16 %v1212_v46 }
  0xc9   : > { %v346_v13 = vpop.permute.xlu1 %345  ;;  %v1238_v14 = vsel %vm689_vm6, 0, %v1237_v24  ;;  %v869_v7 = vrot.slane %v2519_v28, 4  ;;  %v2542_v38 = vperm.slane %v2420_v52, %v2401_v63  ;;  %v1228_v37 = vsel %vm689_vm6, %v2459_v10, %v1227_v49 }
  0xca   : > { %v344_v17 = vpop.permute.xlu0 %343  ;;  %1290 = vrot.lane.b32.xlu2 %v1285_v23, %s1989_s5  ;;  %v1112_v57 = vsel %vm689_vm6, %v1111_v16, %v626_v39  ;;  %v836_v19 = vsel %vm689_vm6, %v835_v9, %v494_v29  ;;  %v1447_v0 = vunpack.c.l.b16 %v1238_v14  ;;  %v937_v58 = vrot.slane %v2462_v47, 4 }
  0xcb   : > { %v2551_v54 = vperm.slane %v1168_v61, %v2401_v63  ;;  %v2554_v22 = vperm.slane %v1084_v53, %v2401_v63  ;;  %v2557_v52 = vperm.slane %v808_v35, %v2401_v63  ;;  %v1301_v59 = vunpack.c.l.b16 %v962_v25 }
  0xcc   : > { %v501_v18 = vshrl.u32 %v346_v13, 16  ;;  %v1412_v46 = vpack.c.b16 %v1409_v42, %v1409_v42  ;;  %v1431_v10 = vpack.c.b16 %v1428_v15, %v1428_v15  ;;  %v1236_v16 = vperm.slane %v1228_v37, %v2424_v4 }
  0xcd   : > { %v897_v9 = vrot.slane %v2542_v38, 4  ;;  %v2562_v49 = vperm.slane %v1112_v57, %v2401_v63  ;;  %v2565_v47 = vperm.slane %v836_v19, %v2401_v63  ;;  %v633_v39 = vshrl.u32 %v2437_v26, 16 }
  0xce   : > { %v2568_v29 = vpop.permute.xlu2 %325  ;;  %v498_v23 = vpack.i.b16 %v346_v13, %v2415_v27  ;;  %v632_v24 = vshrl.u32 %v344_v17, 16  ;;  %v1450_v61 = vpack.c.b16 %v1447_v0, %v1447_v0  ;;  %v938_v53 = vsel %vm689_vm6, 0, %v937_v58 }
  0xcf   : > { %v533_v15 = vshrl.u32 %v2482_v5, 16  ;;  %v1304_v14 = vpack.c.b16 %v1301_v59, %v1301_v59  ;;  %v2578_v57 = vpack.i.b16 %v501_v18, %v500_v21  ;;  %v630_v27 = vpack.i.b16 %v2437_v26, %v344_v17 }
  0xd0   : > { %1417 = vrot.lane.b32.xlu1 %v1412_v46, %s1988_s4  ;;  %1436 = vrot.lane.b32.xlu0 %v1431_v10, %s1989_s5  ;;  %v1485_v19 = vunpack.c.l.b16 %v1236_v16  ;;  %v1358_v10 = vunpack.c.l.b16 %v938_v53  ;;  %v2585_v59 = vrot.slane %v498_v23, 4  ;;  %v2587_v37 = vpack.i.b16 %v633_v39, %v632_v24 }
  0xd1   : > { %v395_v42 = vpop.permute.xlu1 %394  ;;  %v1213_v21 = vrot.slane %v2506_v12, 4  ;;  %v963_v18 = vrot.slane %v2469_v41, 4  ;;  %v2592_v0 = vrot.slane %v630_v27, 4  ;;  %v3236_v23 = vpack.i.b16 %v2236_v45, %v2214_v31 }
  0xd2   : > { %v393_v13 = vpop.permute.xlu0 %392  ;;  %1455 = vrot.lane.b32.xlu2 %v1450_v61, %s1990_s6  ;;  %v1239_v61 = vrot.slane %v1236_v16, 4  ;;  %v1488_v56 = vpack.c.b16 %v1485_v19, %v1485_v19  ;;  %v1361_v53 = vpack.c.b16 %v1358_v10, %v1358_v10  ;;  %v560_v12 = vpack.i.b16 %v2079_v2, %v2087_v6 }
  0xd3   : > { %v532_v58 = vshrl.u32 %v393_v13, 16  ;;  %v530_v46 = vpack.i.b16 %v2482_v5, %v393_v13  ;;  %v576_v5 = vshrl.u32 %v2527_v60, 16  ;;  %v3237_v27 = vshrl.u32 %v2087_v6, 16 }
  0xd4   : > { %v3238_v31 = vshrl.u32 %v2079_v2, 16  ;;  %v1214_v13 = vsel %vm689_vm6, 0, %v1213_v21  ;;  %v964_v10 = vsel %vm689_vm6, 0, %v963_v18  ;;  %v3241_v25 = vshrl.u32 %v2076_v1, 16 }
  0xd5   : > { %v534_v26 = vpack.i.b16 %v533_v15, %v532_v58  ;;  %v857_v17 = vrot.slane %v530_v46, 4  ;;  %v1504_v18 = vunpack.c.l.b16 %v1214_v13 }
  0xd6   : > { %v2601_v15 = vpop.permute.xlu2 %331  ;;  %v2611_v45 = vpack.i.b16 %v3238_v31, %v3237_v27  ;;  %v1377_v31 = vunpack.c.l.b16 %v964_v10 }
  0xd7   : > { %v858_v39 = vsel %vm689_vm6, %v857_v17, %v3236_v23  ;;  %v885_v24 = vrot.slane %v534_v26, 4 }
  0xd8   : > { %v862_v16 = vperm.slane %v858_v39, %v2401_v63  ;;  %1309 = vrot.lane.b32.xlu1 %v1304_v14, %s1990_s6  ;;  %1493 = vrot.lane.b32.xlu0 %v1488_v56, %s1987_s3  ;;  %v1240_v14 = vsel %vm689_vm6, 0, %v1239_v61  ;;  %v664_v56 = vshrl.u32 %v395_v42, 16 }
  0xd9   : > { %v886_v19 = vsel %vm689_vm6, %v885_v24, %v2243_v48  ;;  %v203_v58 = vpop.permute.xlu1 %202 }
  0xda   : > { %v871_v26 = vrot.slane %v862_v16, 4  ;;  %v890_v17 = vperm.slane %v886_v19, %v2401_v63  ;;  %v399_v23 = vpop.permute.xlu0 %398  ;;  %1366 = vrot.lane.b32.xlu2 %v1361_v53, %s1991_s7  ;;  %v870_v48 = vsel %vm689_vm6, %v869_v7, %v862_v16  ;;  %v1523_v19 = vunpack.c.l.b16 %v1240_v14 }
  0xdb   : > { %v662_v21 = vpack.i.b16 %v399_v23, %v395_v42  ;;  %v665_v39 = vshrl.u32 %v399_v23, 16  ;;  %v2626_v24 = vperm.slane %v870_v48, %v2424_v4  ;;  %v3240_v53 = vshrl.u32 %v2082_v3, 16 }
  0xdc   : > { %v899_v27 = vrot.slane %v890_v17, 4  ;;  %v898_v61 = vsel %vm689_vm6, %v897_v9, %v890_v17  ;;  %v872_v9 = vsel %vm689_vm6, %v2519_v28, %v871_v26  ;;  %v3242_v14 = vpack.i.b16 %v2202_v20, %v2177_v62 }
  0xdd   : > { %3239 = vst [vmem:[#allocation8_spill] sm:$0xff] %v2626_v24  ;;  %v666_v35 = vpack.i.b16 %v665_v39, %v664_v56  ;;  %v1133_v41 = vrot.slane %v662_v21, 4  ;;  %v430_v7 = vpack.i.b16 %v3241_v25, %v3240_v53  ;;  %v2636_v42 = vperm.slane %v898_v61, %v2424_v4 }
  0xde   : > { %v900_v10 = vsel %vm689_vm6, %v2542_v38, %v899_v27  ;;  %v3243_v17 = vshrl.u32 %v2157_v51, 16  ;;  %v3244_v23 = vshrl.u32 %v2221_v34, 16  ;;  %v881_v21 = vrot.slane %v2626_v24, 4  ;;  %v2666_v27 = vpop.permute.xlu2 %198 }
  0xdf   : > { %v1134_v56 = vsel %vm689_vm6, %v1133_v41, %v3242_v14  ;;  %v1161_v25 = vrot.slane %v666_v35, 4  ;;  %v2657_v28 = vpack.c.b16 %v1504_v18, %v1504_v18  ;;  %v2659_v26 = vpack.c.b16 %v1377_v31, %v1377_v31 }
  0xe0   : > { %v2653_v48 = vpack.i.b16 %v3244_v23, %v3243_v17  ;;  %v1138_v39 = vperm.slane %v1134_v56, %v2401_v63  ;;  %v2661_v38 = vpack.c.b16 %v1523_v19, %v1523_v19  ;;  %v444_v62 = vshrl.u32 %v203_v58, 16 }
  0xe1   : > { %v1162_v20 = vsel %vm689_vm6, %v1161_v25, %v2228_v40  ;;  %v209_v35 = vpop.permute.xlu1 %208  ;;  %v617_v41 = vshrl.u32 %v2601_v15, 16  ;;  %v909_v61 = vrot.slane %v2636_v42, 4  ;;  %v2676_v40 = vsel %vm689_vm6, 0, %v881_v21 }
  0xe2   : > { %v2670_v53 = vperm.slane %v1162_v20, %v2401_v63  ;;  %v574_v18 = vpack.i.b16 %v209_v35, %v2527_v60  ;;  %v577_v31 = vshrl.u32 %v209_v35, 16  ;;  %v207_v14 = vpop.permute.xlu0 %206  ;;  %v3245_v25 = vrot.slane %v2523_v11, 4 }
  0xe3   : > { %v442_v56 = vpack.i.b16 %v207_v14, %v203_v58  ;;  %v445_v17 = vshrl.u32 %v207_v14, 16  ;;  %v3246_v35 = vrot.slane %v2551_v54, 4  ;;  %v2688_v19 = vperm.slane %v872_v9, %v2424_v4 }
  0xe4   : > { %v1146_v23 = vsel %vm689_vm6, %v3245_v25, %v1138_v39  ;;  %v578_v20 = vpack.i.b16 %v577_v31, %v576_v5  ;;  %v971_v13 = vrot.slane %v574_v18, 4  ;;  %v1147_v58 = vrot.slane %v1138_v39, 4 }
  0xe5   : > { %v1174_v16 = vsel %vm689_vm6, %v3246_v35, %v2670_v53  ;;  %v446_v14 = vpack.i.b16 %v445_v17, %v444_v62  ;;  %v695_v21 = vrot.slane %v442_v56, 4  ;;  %v2691_v46 = vsel %vm689_vm6, 0, %v909_v61 }
  0xe6   : > { %v972_v60 = vsel %vm689_vm6, %v971_v13, %v560_v12  ;;  %v999_v5 = vrot.slane %v578_v20, 4  ;;  %v3247_v18 = vshrl.u32 %v2134_v32, 16  ;;  %v3248_v31 = vshrl.u32 %v2151_v44, 16 }
  0xe7   : > { %v2704_v9 = vperm.slane %v1146_v23, %v2424_v4  ;;  %v723_v39 = vrot.slane %v446_v14, 4  ;;  %v437_v62 = vshrl.u32 %v2666_v27, 16  ;;  %v1262_v61 = vunpack.c.l.b16 %v2636_v42 }
  0xe8   : > { %v2701_v25 = vpack.i.b16 %v3248_v31, %v3247_v18  ;;  %v2709_v56 = vperm.slane %v1174_v16, %v2424_v4  ;;  %v2715_v13 = vperm.slane %v900_v10, %v2424_v4  ;;  %v2718_v17 = vperm.slane %v972_v60, %v2401_v63 }
  0xe9   : > { %3249 = vst [vmem:[#allocation9_spill] sm:$0xff] %v2704_v9  ;;  %v3250_v23 = vpack.i.b16 %v2076_v1, %v2082_v3  ;;  %v330_v35 = vpop.permute.xlu1 %329  ;;  %v1148_v14 = vsel %vm689_vm6, %v2523_v11, %v1147_v58  ;;  %v1000_v18 = vsel %vm689_vm6, %v999_v5, %v2611_v45  ;;  %v1157_v60 = vrot.slane %v2704_v9, 4 }
  0xea   : > { %v482_v10 = vpack.i.b16 %v330_v35, %v2568_v29  ;;  %v485_v31 = vshrl.u32 %v330_v35, 16  ;;  %v328_v2 = vpop.permute.xlu0 %327  ;;  %v724_v12 = vsel %vm689_vm6, %v723_v39, %v430_v7  ;;  %v3251_v45 = vshrl.u32 %v2568_v29, 16 }
  0xeb   : > { %v696_v20 = vsel %vm689_vm6, %v695_v21, %v3250_v23  ;;  %v616_v1 = vshrl.u32 %v328_v2, 16  ;;  %v614_v3 = vpack.i.b16 %v2601_v15, %v328_v2  ;;  %v1408_v21 = vunpack.c.l.b16 %v2709_v56  ;;  %v2734_v23 = vpop.permute.xlu2 %220 }
  0xec   : > { %v2737_v11 = vperm.slane %v696_v20, %v2401_v63  ;;  %v486_v58 = vpack.i.b16 %v485_v31, %v3251_v45  ;;  %v802_v5 = vsel %vm689_vm6, %v2585_v59, %v482_v10  ;;  %v2745_v7 = vperm.slane %v1000_v18, %v2401_v63 }
  0xed   : > { %v806_v15 = vperm.slane %v802_v5, %v2401_v63  ;;  %v618_v39 = vpack.i.b16 %v617_v41, %v616_v1  ;;  %v1078_v2 = vsel %vm689_vm6, %v2592_v0, %v614_v3  ;;  %v2751_v20 = vperm.slane %v724_v12, %v2401_v63 }
  0xee   : > { %v3252_v29 = vrot.slane %v2578_v57, 4  ;;  %v2757_v59 = vperm.slane %v1078_v2, %v2401_v63  ;;  %v2760_v10 = vsel %vm689_vm6, 0, %v1157_v60  ;;  %v3253_v41 = vrot.slane %v2587_v37, 4 }
  0xef   : > { %v815_v18 = vrot.slane %v806_v15, 4  ;;  %v3254_v12 = vrot.slane %v2557_v52, 4  ;;  %v3255_v37 = vrot.slane %v2565_v47, 4  ;;  %v2811_v9 = vperm.slane %v1148_v14, %v2424_v4 }
  0xf0   : > { %v830_v31 = vsel %vm689_vm6, %v3252_v29, %v486_v58  ;;  %v1106_v0 = vsel %vm689_vm6, %v3253_v41, %v618_v39  ;;  %v3259_v42 = vunpack.c.l.b16 %v2676_v40  ;;  %v1185_v40 = vrot.slane %v2709_v56, 4 }
  0xf1   : > { %v2763_v45 = vperm.slane %v830_v31, %v2401_v63  ;;  %v814_v57 = vsel %vm689_vm6, %v3254_v12, %v806_v15  ;;  %v2774_v58 = vperm.slane %v1106_v0, %v2401_v63  ;;  %v197_v2 = vpop.permute.xlu1 %196  ;;  %v3256_v15 = vrot.slane %v2554_v22, 4 }
  0xf2   : > { %v2777_v60 = vperm.slane %v814_v57, %v2424_v4  ;;  %v816_v31 = vsel %vm689_vm6, %v2557_v52, %v815_v18  ;;  %v195_v0 = vpop.permute.xlu0 %194  ;;  %v3257_v57 = vrot.slane %v2562_v49, 4 }
  0xf3   : > { %v842_v39 = vsel %vm689_vm6, %v3255_v37, %v2763_v45  ;;  %v1090_v29 = vsel %vm689_vm6, %v3256_v15, %v2757_v59  ;;  %v436_v5 = vshrl.u32 %v195_v0, 16  ;;  %v434_v35 = vpack.i.b16 %v2666_v27, %v195_v0 }
  0xf4   : > { %v848_v12 = vperm.slane %v842_v39, %v2424_v4  ;;  %v1118_v1 = vsel %vm689_vm6, %v3257_v57, %v2774_v58  ;;  %v825_v3 = vrot.slane %v2777_v60, 4  ;;  %v2801_v41 = vperm.slane %v1090_v29, %v2424_v4 }
  0xf5   : > { %v1124_v15 = vperm.slane %v1118_v1, %v2424_v4  ;;  %v2804_v39 = vperm.slane %v816_v31, %v2424_v4  ;;  %v438_v16 = vpack.i.b16 %v437_v62, %v436_v5  ;;  %v688_v6 = vrot.slane %v434_v35, 4 }
  0xf6   : > { %v1261_v52 = vunpack.c.l.b16 %v848_v12  ;;  %v853_v18 = vrot.slane %v848_v12, 4  ;;  %v826_v37 = vsel %vm689_vm6, 0, %v825_v3  ;;  %v1091_v29 = vrot.slane %v2757_v59, 4 }
  0xf7   : > { %v1407_v57 = vunpack.c.l.b16 %v1124_v15  ;;  %v1280_v0 = vunpack.c.l.b16 %v826_v37  ;;  %v717_v12 = vrot.slane %v438_v16, 4  ;;  %v3258_v62 = vpack.i.b16 %v2221_v34, %v2157_v51  ;;  %v2827_v51 = vpop.permute.xlu2 %210 }
  0xf8   : > { %v1265_v27 = vpack.c.b16 %v1262_v61, %v1261_v52  ;;  %v854_v1 = vsel %vm689_vm6, 0, %v853_v18  ;;  %v1101_v3 = vrot.slane %v2801_v41, 4  ;;  %v1318_v14 = vunpack.c.l.b16 %v2804_v39 }
  0xf9   : > { %v1411_v24 = vpack.c.b16 %v1408_v21, %v1407_v57  ;;  %v1299_v31 = vunpack.c.l.b16 %v854_v1  ;;  %v690_v35 = vsel %vm689_vm6, %v688_v6, %v3258_v62  ;;  %v1284_v61 = vpack.c.b16 %v3259_v42, %v1280_v0  ;;  %v219_v21 = vpop.permute.xlu1 %218 }
  0xfa   : > { %1269 = vrot.lane.b32.xlu1 %v1265_v27, %s1988_s4  ;;  %v843_v5 = vrot.slane %v2763_v45, 4  ;;  %v718_v16 = vsel %vm689_vm6, %v717_v12, %v2653_v48  ;;  %v3260_v34 = vunpack.c.l.b16 %v2691_v46  ;;  %v568_v59 = vshrl.u32 %v197_v2, 16  ;;  %v201_v37 = vpop.permute.xlu0 %200 }
  0xfb   : > { %1415 = vrot.lane.b32.xlu0 %v1411_v24, %s1988_s4  ;;  %1288 = vrot.lane.b32.xlu2 %v1284_v61, %s1989_s5  ;;  %v452_v45 = vshrl.u32 %v2827_v51, 16  ;;  %v3261_v52 = vunpack.c.l.b16 %v2688_v19  ;;  %v1338_v24 = vunpack.c.l.b16 %v2715_v13  ;;  %v2842_v18 = vperm.slane %v690_v35, %v2401_v63 }
  0xfc   : > { %v2831_v6 = vpack.c.b16 %v3260_v34, %v1299_v31  ;;  %v566_v46 = vpack.i.b16 %v201_v37, %v197_v2  ;;  %v569_v57 = vshrl.u32 %v201_v37, 16  ;;  %v1092_v56 = vsel %vm689_vm6, %v2554_v22, %v1091_v29 }
  0xfd   : > { %v2838_v48 = vpack.c.b16 %v3261_v52, %v1318_v14  ;;  %v2847_v27 = vperm.slane %v718_v16, %v2401_v63  ;;  %v1102_v0 = vsel %vm689_vm6, 0, %v1101_v3  ;;  %v2851_v1 = vperm.slane %v1092_v56, %v2424_v4 }
  0xfe   : > { %v1129_v12 = vrot.slane %v1124_v15, 4  ;;  %v570_v31 = vpack.i.b16 %v569_v57, %v568_v59  ;;  %v965_v62 = vrot.slane %v566_v46, 4  ;;  %v1186_v42 = vsel %vm689_vm6, 0, %v1185_v40 }
  0xff   : > { %v844_v2 = vsel %vm689_vm6, %v2565_v47, %v843_v5  ;;  %v1464_v35 = vunpack.c.l.b16 %v2851_v1  ;;  %v1465_v22 = vunpack.c.l.b16 %v2811_v9  ;;  %v1119_v3 = vrot.slane %v2774_v58, 4 }
 0x100   : > { %v1130_v29 = vsel %vm689_vm6, 0, %v1129_v12  ;;  %v2860_v61 = vperm.slane %v844_v2, %v2424_v4  ;;  %v993_v14 = vrot.slane %v570_v31, 4  ;;  %v1446_v16 = vunpack.c.l.b16 %v1186_v42 }
 0x101   : > { %v1445_v15 = vunpack.c.l.b16 %v1130_v29  ;;  %v460_v34 = vshrl.u32 %v219_v21, 16  ;;  %v1426_v40 = vunpack.c.l.b16 %v1102_v0  ;;  %v2865_v47 = vpack.c.b16 %v1465_v22, %v1464_v35  ;;  %v225_v52 = vpop.permute.xlu1 %224 }
 0x102   : > { %1512 = vrot.lane.b32.xlu1 %v2657_v28, %s1991_s7  ;;  %v1337_v5 = vunpack.c.l.b16 %v2860_v61  ;;  %v3262_v59 = vpack.i.b16 %v2151_v44, %v2134_v32  ;;  %v994_v58 = vsel %vm689_vm6, %v993_v14, %v2701_v25  ;;  %v3263_v28 = vrot.slane %v2751_v20, 4  ;;  %v223_v0 = vpop.permute.xlu0 %222 }
 0x103   : > { %1385 = vrot.lane.b32.xlu0 %v2659_v26, %s1992_s8  ;;  %v2876_v46 = vpack.c.b16 %v1446_v16, %v1445_v15  ;;  %v2883_v56 = vperm.slane %v994_v58, %v2401_v63  ;;  %v590_v32 = vpack.i.b16 %v225_v52, %v2734_v23  ;;  %v593_v44 = vshrl.u32 %v225_v52, 16  ;;  %1531 = vrot.lane.b32.xlu2 %v2661_v38, %s1992_s8 }
 0x104   : > { %v966_v37 = vsel %vm689_vm6, %v965_v62, %v3262_v59  ;;  %v730_v57 = vsel %vm689_vm6, %v3263_v28, %v2847_v27  ;;  %v3264_v26 = vrot.slane %v2737_v11, 4  ;;  %v458_v12 = vpack.i.b16 %v223_v0, %v219_v21  ;;  %v217_v62 = vpop.permute.xlu2 %216 }
 0x105   : > { %v461_v31 = vshrl.u32 %v223_v0, 16  ;;  %v2892_v42 = vpack.c.b16 %v1338_v24, %v1337_v5  ;;  %v827_v2 = vrot.slane %v2804_v39, 4  ;;  %v3265_v35 = vshrl.u32 %v2734_v23, 16 }
 0x106   : > { %v702_v25 = vsel %vm689_vm6, %v3264_v26, %v2842_v18  ;;  %v1028_v29 = vsel %vm689_vm6, %v2443_v50, %v590_v32  ;;  %v3266_v38 = vrot.slane %v2745_v7, 4  ;;  %v2904_v15 = vperm.slane %v730_v57, %v2424_v4 }
 0x107   : > { %v594_v22 = vpack.i.b16 %v593_v44, %v3265_v35  ;;  %v2907_v21 = vperm.slane %v1028_v29, %v2401_v63  ;;  %v462_v24 = vpack.i.b16 %v461_v31, %v460_v34  ;;  %v752_v39 = vsel %vm689_vm6, %v2433_v36, %v458_v12 }
 0x108   : > { %v1006_v14 = vsel %vm689_vm6, %v3266_v38, %v2883_v56  ;;  %v3267_v50 = vrot.slane %v2232_v43, 4  ;;  %v3268_v5 = vunpack.c.l.b16 %v2760_v10  ;;  %v585_v58 = vshrl.u32 %v217_v62, 16 }
 0x109   : > { %v2912_v23 = vperm.slane %v1006_v14, %v2424_v4  ;;  %v2920_v52 = vperm.slane %v702_v25, %v2424_v4  ;;  %v2923_v28 = vperm.slane %v966_v37, %v2401_v63  ;;  %v2926_v34 = vperm.slane %v752_v39, %v2401_v63 }
 0x10a   : > { %v1056_v16 = vsel %vm689_vm6, %v3267_v50, %v594_v22  ;;  %v1430_v59 = vpack.c.b16 %v3268_v5, %v1426_v40  ;;  %v3269_v36 = vrot.slane %v2210_v30, 4  ;;  %v828_v43 = vsel %vm689_vm6, 0, %v827_v2  ;;  %v215_v30 = vpop.permute.xlu1 %214  ;;  %v213_v2 = vpop.permute.xlu0 %212 }
 0x10b   : > { %v1033_v32 = vrot.slane %v2907_v21, 4  ;;  %v2934_v10 = vperm.slane %v1056_v16, %v2401_v63  ;;  %v1259_v40 = vunpack.c.l.b16 %v2904_v15  ;;  %v883_v37 = vrot.slane %v2688_v19, 4  ;;  %1307 = vrot.lane.b32.xlu0 %v2831_v6, %s1990_s6  ;;  %1326 = vrot.lane.b32.xlu2 %v2838_v48, %s1986_s30 }
 0x10c   : > { %v780_v57 = vsel %vm689_vm6, %v3269_v36, %v462_v24  ;;  %1434 = vrot.lane.b32.xlu1 %v1430_v59, %s1989_s5  ;;  %v1405_v0 = vunpack.c.l.b16 %v2912_v23  ;;  %v1120_v26 = vsel %vm689_vm6, %v2562_v49, %v1119_v3  ;;  %v3270_v25 = vrot.slane %v2670_v53, 4  ;;  %v3272_v59 = vld [vmem:[#allocation5_spill] sm:$0xff] }
 0x10d   : > { %v2940_v44 = vperm.slane %v780_v57, %v2401_v63  ;;  %v450_v31 = vpack.i.b16 %v215_v30, %v2827_v51  ;;  %v453_v19 = vshrl.u32 %v215_v30, 16  ;;  %v713_v6 = vrot.slane %v2920_v52, 4 }
 0x10e   : > { %v1176_v12 = vsel %vm689_vm6, %v2551_v54, %v3270_v25  ;;  %v1356_v35 = vunpack.c.l.b16 %v828_v43  ;;  %v757_v22 = vrot.slane %v2926_v34, 4  ;;  %v584_v29 = vshrl.u32 %v213_v2, 16 }
 0x10f   : > { %v582_v38 = vpack.i.b16 %v217_v62, %v213_v2  ;;  %v884_v49 = vsel %vm689_vm6, 0, %v883_v37  ;;  %v454_v53 = vpack.i.b16 %v453_v19, %v452_v45  ;;  %v746_v54 = vsel %vm689_vm6, %v2456_v8, %v450_v31 }
 0x110   : > { %v1357_v3 = vunpack.c.l.b16 %v884_v49  ;;  %v2962_v14 = vperm.slane %v1120_v26, %v2424_v4  ;;  %v2965_v48 = vperm.slane %v746_v54, %v2401_v63  ;;  %v586_v24 = vpack.i.b16 %v585_v58, %v584_v29 }
 0x111   : > { %v1022_v39 = vsel %vm689_vm6, %v2487_v33, %v582_v38  ;;  %v2970_v62 = vperm.slane %v1176_v12, %v2424_v4  ;;  %v785_v51 = vrot.slane %v2940_v44, 4  ;;  %v3271_v45 = vrot.slane %v2290_v55, 4 }
 0x112   : > { %v714_v50 = vsel %vm689_vm6, 0, %v713_v6  ;;  %v2977_v16 = vpack.c.b16 %v1357_v3, %v1356_v35  ;;  %v3273_v58 = vrot.slane %v3272_v59, 4  ;;  %v758_v36 = vsel %vm689_vm6, %v757_v22, %v2965_v48 }
 0x113   : > { %v774_v8 = vsel %vm689_vm6, %v3271_v45, %v454_v53  ;;  %v1483_v57 = vunpack.c.l.b16 %v2962_v14  ;;  %v1061_v55 = vrot.slane %v2934_v10, 4  ;;  %v1026_v43 = vperm.slane %v1022_v39, %v2401_v63  ;;  %1472 = vrot.lane.b32.xlu0 %v2865_v47, %s1986_s30  ;;  %1345 = vrot.lane.b32.xlu2 %v2892_v42, %s1987_s3 }
 0x114   : > { %v2980_v5 = vperm.slane %v774_v8, %v2401_v63  ;;  %v1050_v33 = vsel %vm689_vm6, %v3273_v58, %v586_v24  ;;  %1453 = vrot.lane.b32.xlu1 %v2876_v46, %s1990_s6  ;;  %v2996_v30 = vperm.slane %v758_v36, %v2424_v4  ;;  %v1484_v25 = vunpack.c.l.b16 %v2970_v62 }
 0x115   : > { %v2991_v37 = vperm.slane %v1050_v33, %v2401_v63  ;;  %v1103_v12 = vrot.slane %v2851_v1, 4  ;;  %v1159_v31 = vrot.slane %v2811_v9, 4  ;;  %v1278_v47 = vunpack.c.l.b16 %v714_v50 }
 0x116   : > { %v786_v26 = vsel %vm689_vm6, %v785_v51, %v2980_v5  ;;  %v769_v19 = vrot.slane %v2996_v30, 4  ;;  %v1487_v6 = vpack.c.b16 %v1484_v25, %v1483_v57  ;;  %v3274_v53 = vrot.slane %v2718_v17, 4 }
 0x117   : > { %v1062_v63 = vsel %vm689_vm6, %v1061_v55, %v2991_v37  ;;  %v792_v46 = vperm.slane %v786_v26, %v2424_v4  ;;  %v1104_v35 = vsel %vm689_vm6, 0, %v1103_v12  ;;  %v1160_v1 = vsel %vm689_vm6, 0, %v1159_v31 }
 0x118   : > { %v1068_v2 = vperm.slane %v1062_v63, %v2424_v4  ;;  %v770_v9 = vsel %vm689_vm6, 0, %v769_v19  ;;  %v1502_v29 = vunpack.c.l.b16 %v1104_v35  ;;  %v1503_v42 = vunpack.c.l.b16 %v1160_v1 }
 0x119   : > { %v1260_v22 = vunpack.c.l.b16 %v792_v46  ;;  %v1279_v49 = vunpack.c.l.b16 %v770_v9  ;;  %v978_v54 = vsel %vm689_vm6, %v3274_v53, %v2923_v28  ;;  %v1034_v3 = vsel %vm689_vm6, %v1033_v32, %v1026_v43 }
 0x11a   : > { %v1406_v38 = vunpack.c.l.b16 %v1068_v2  ;;  %v1506_v39 = vpack.c.b16 %v1503_v42, %v1502_v29  ;;  %v3023_v8 = vperm.slane %v1034_v3, %v2424_v4  ;;  %v3027_v50 = vperm.slane %v978_v54, %v2424_v4 }
 0x11b   : > { %v1264_v24 = vpack.c.b16 %v1260_v22, %v1259_v40  ;;  %v1283_v45 = vpack.c.b16 %v1279_v49, %v1278_v47  ;;  %v855_v59 = vrot.slane %v2860_v61, 4  ;;  %v911_v58 = vrot.slane %v2715_v13, 4 }
 0x11c   : > { %v1410_v51 = vpack.c.b16 %v1406_v38, %v1405_v0  ;;  %v1035_v32 = vrot.slane %v1026_v43, 4  ;;  %v1045_v40 = vrot.slane %v3023_v8, 4  ;;  %v787_v0 = vrot.slane %v2980_v5, 4 }
 0x11d   : > { %1267 = vrot.lane.b32.xlu1 %v1264_v24, %s1988_s4  ;;  %1286 = vrot.lane.b32.xlu2 %v1283_v45, %s1989_s5  ;;  %v989_v33 = vrot.slane %v3027_v50, 4  ;;  %v797_v36 = vrot.slane %v792_v46, 4  ;;  %v856_v57 = vsel %vm689_vm6, 0, %v855_v59  ;;  %v1073_v55 = vrot.slane %v1068_v2, 4 }
 0x11e   : > { %1413 = vrot.lane.b32.xlu0 %v1410_v51, %s1988_s4  ;;  %v912_v26 = vsel %vm689_vm6, 0, %v911_v58  ;;  %v1375_v25 = vunpack.c.l.b16 %v856_v57  ;;  %v1131_v61 = vrot.slane %v2962_v14, 4  ;;  %v759_v13 = vrot.slane %v2965_v48, 4 }
 0x11f   : > { %v741_v12 = vrot.slane %v2904_v15, 4  ;;  %v1376_v43 = vunpack.c.l.b16 %v912_v26  ;;  %v1187_v31 = vrot.slane %v2970_v62, 4  ;;  %v1046_v5 = vsel %vm689_vm6, 0, %v1045_v40 }
 0x120   : > { %v1017_v63 = vrot.slane %v2912_v23, 4  ;;  %v1132_v46 = vsel %vm689_vm6, 0, %v1131_v61  ;;  %v1036_v19 = vsel %vm689_vm6, %v2907_v21, %v1035_v32  ;;  %v798_v14 = vsel %vm689_vm6, 0, %v797_v36 }
 0x121   : > { %v1379_v47 = vpack.c.b16 %v1376_v43, %v1375_v25  ;;  %v1188_v48 = vsel %vm689_vm6, 0, %v1187_v31  ;;  %v1521_v15 = vunpack.c.l.b16 %v1132_v46  ;;  %v990_v62 = vsel %vm689_vm6, 0, %v989_v33 }
 0x122   : > { %v1074_v23 = vsel %vm689_vm6, 0, %v1073_v55  ;;  %v1522_v2 = vunpack.c.l.b16 %v1188_v48  ;;  %v788_v35 = vsel %vm689_vm6, %v2940_v44, %v787_v0  ;;  %v1425_v21 = vunpack.c.l.b16 %v1046_v5 }
 0x123   : > { %v760_v1 = vsel %vm689_vm6, %v2926_v34, %v759_v13  ;;  %v979_v22 = vrot.slane %v2923_v28, 4  ;;  %v1298_v9 = vunpack.c.l.b16 %v798_v14  ;;  %v703_v42 = vrot.slane %v2842_v18, 4  ;;  %v3092_v13 = vpop.permute.xlu2 %1347 }
 0x124   : > { %v1525_v29 = vpack.c.b16 %v1522_v2, %v1521_v15  ;;  %v1424_v38 = vunpack.c.l.b16 %v990_v62  ;;  %v1444_v49 = vunpack.c.l.b16 %v1074_v23  ;;  %v1063_v44 = vrot.slane %v2991_v37, 4 }
 0x125   : > { %1491 = vrot.lane.b32.xlu1 %v1487_v6, %s1987_s3  ;;  %1510 = vrot.lane.b32.xlu2 %v1506_v39, %s1991_s7  ;;  %v742_v6 = vsel %vm689_vm6, 0, %v741_v12  ;;  %v980_v39 = vsel %vm689_vm6, %v2718_v17, %v979_v22  ;;  %v1044_v34 = vperm.slane %v1036_v19, %v2424_v4  ;;  %v704_v51 = vsel %vm689_vm6, %v2737_v11, %v703_v42 }
 0x126   : > { %1364 = vrot.lane.b32.xlu0 %v2977_v16, %s1991_s7  ;;  %v1018_v16 = vsel %vm689_vm6, 0, %v1017_v63  ;;  %v1297_v53 = vunpack.c.l.b16 %v742_v6  ;;  %v1429_v54 = vpack.c.b16 %v1425_v21, %v1424_v38  ;;  %v768_v18 = vperm.slane %v760_v1, %v2424_v4 }
 0x127   : > { %v1443_v3 = vunpack.c.l.b16 %v1018_v16  ;;  %v1064_v37 = vsel %vm689_vm6, %v2934_v10, %v1063_v44  ;;  %v731_v45 = vrot.slane %v2847_v27, 4  ;;  %v988_v17 = vperm.slane %v980_v39, %v2424_v4 }
 0x128   : > { %v1302_v24 = vpack.c.b16 %v1298_v9, %v1297_v53  ;;  %v712_v59 = vperm.slane %v704_v51, %v2424_v4  ;;  %v1007_v58 = vrot.slane %v2883_v56, 4  ;;  %v1463_v32 = vunpack.c.l.b16 %v1044_v34 }
 0x129   : > { %v1448_v28 = vpack.c.b16 %v1444_v49, %v1443_v3  ;;  %v771_v40 = vrot.slane %v768_v18, 4  ;;  %v1462_v11 = vunpack.c.l.b16 %v988_v17  ;;  %v732_v0 = vsel %vm689_vm6, %v2751_v20, %v731_v45 }
 0x12a   : > { %v796_v33 = vperm.slane %v788_v35, %v2424_v4  ;;  %v715_v36 = vrot.slane %v712_v59, 4  ;;  %v1008_v10 = vsel %vm689_vm6, %v2745_v7, %v1007_v58  ;;  %v740_v57 = vperm.slane %v732_v0, %v2424_v4  ;;  %v3276_v0 = vld [vmem:[#allocation7_spill] sm:$0xff] }
 0x12b   : > { %v1467_v27 = vpack.c.b16 %v1463_v32, %v1462_v11  ;;  %v772_v56 = vsel %vm689_vm6, 0, %v771_v40  ;;  %v1072_v55 = vperm.slane %v1064_v37, %v2424_v4  ;;  %v1317_v20 = vunpack.c.l.b16 %v768_v18  ;;  %v1291_v16 = vpop.permute.xlu2 %1290  ;;  %v3275_v11 = vld [vmem:[#allocation6_spill] sm:$0xff] }
 0x12c   : > { %v1336_v26 = vunpack.c.l.b16 %v796_v33  ;;  %v716_v25 = vsel %vm689_vm6, 0, %v715_v36  ;;  %v1016_v61 = vperm.slane %v1008_v10, %v2424_v4  ;;  %v1316_v12 = vunpack.c.l.b16 %v712_v59 }
 0x12d   : > { %1432 = vrot.lane.b32.xlu1 %v1429_v54, %s1989_s5  ;;  %1451 = vrot.lane.b32.xlu2 %v1448_v28, %s1990_s6  ;;  %v1355_v7 = vunpack.c.l.b16 %v772_v56  ;;  %v1047_v43 = vrot.slane %v1044_v34, 4  ;;  %v1335_v31 = vunpack.c.l.b16 %v740_v57  ;;  %v1075_v5 = vrot.slane %v1072_v55, 4 }
 0x12e   : > { %1305 = vrot.lane.b32.xlu0 %v1302_v24, %s1990_s6  ;;  %v1321_v63 = vpack.c.b16 %v1317_v20, %v1316_v12  ;;  %v1354_v46 = vunpack.c.l.b16 %v716_v25  ;;  %v991_v19 = vrot.slane %v988_v17, 4  ;;  %v1482_v23 = vunpack.c.l.b16 %v1072_v55  ;;  %s1922_s6 = scalar_lea.hbm %s3208_s2, 16 }
 0x12f   : > { %v1340_v14 = vpack.c.b16 %v1336_v26, %v1335_v31  ;;  %v1048_v15 = vsel %vm689_vm6, 0, %v1047_v43  ;;  %v1076_v4 = vsel %vm689_vm6, 0, %v1075_v5  ;;  %v799_v21 = vrot.slane %v796_v33, 4 }
 0x130   : > { %v1359_v48 = vpack.c.b16 %v1355_v7, %v1354_v46  ;;  %v992_v62 = vsel %vm689_vm6, 0, %v991_v19  ;;  %v1501_v2 = vunpack.c.l.b16 %v1048_v15  ;;  %v1481_v6 = vunpack.c.l.b16 %v1016_v61 }
 0x131   : > { %v1520_v1 = vunpack.c.l.b16 %v1076_v4  ;;  %v1500_v22 = vunpack.c.l.b16 %v992_v62  ;;  %v743_v9 = vrot.slane %v740_v57, 4  ;;  %v800_v49 = vsel %vm689_vm6, 0, %v799_v21 }
 0x132   : > { %v1374_v54 = vunpack.c.l.b16 %v800_v49  ;;  %v1392_v3 = vunpack.c.l.b16 %v3027_v50  ;;  %v1393_v24 = vunpack.c.l.b16 %v3023_v8  ;;  %v1246_v39 = vunpack.c.l.b16 %v2920_v52  ;;  %v1329_v51 = vpop.permute.xlu0 %1328 }
 0x133   : > { %v1505_v38 = vpack.c.b16 %v1501_v2, %v1500_v22  ;;  %v744_v53 = vsel %vm689_vm6, 0, %v743_v9  ;;  %v1247_v28 = vunpack.c.l.b16 %v2996_v30  ;;  %v1456_v17 = vpop.permute.xlu2 %1455  ;;  %v1250_v52 = vunpack.c.l.b16 %v3275_v11 }
 0x134   : > { %v1373_v34 = vunpack.c.l.b16 %v744_v53  ;;  %v3110_v18 = vpack.c.b16 %v1393_v24, %v1392_v3  ;;  %v1396_v30 = vunpack.c.l.b16 %v3276_v0  ;;  %v1394_v53 = vunpack.c.l.b16 %v2801_v41  ;;  %v3278_v3 = vld [vmem:[#allocation9_spill] sm:$0xff] }
 0x135   : > { %1383 = vrot.lane.b32.xlu1 %v1379_v47, %s1992_s8  ;;  %1470 = vrot.lane.b32.xlu2 %v1467_v27, %s1986_s30  ;;  %v1019_v47 = vrot.slane %v1016_v61, 4  ;;  %v3112_v37 = vpack.c.b16 %v1247_v28, %v1246_v39  ;;  %v1253_v27 = vpack.c.b16 %v1250_v52, %v1250_v52  ;;  %v1395_v24 = vunpack.c.l.b16 %v3278_v3 }
 0x136   : > { %1529 = vrot.lane.b32.xlu0 %v1525_v29, %s1992_s8  ;;  %v1486_v29 = vpack.c.b16 %v1482_v23, %v1481_v6  ;;  %v1378_v45 = vpack.c.b16 %v1374_v54, %v1373_v34  ;;  %v1399_v56 = vpack.c.b16 %v1396_v30, %v1396_v30 }
 0x137   : > { %v1020_v35 = vsel %vm689_vm6, 0, %v1019_v47  ;;  %v1398_v34 = vpack.c.b16 %v1395_v24, %v1394_v53 }
 0x138   : > { %v1519_v42 = vunpack.c.l.b16 %v1020_v35 }
 0x13a   : > { %v1524_v44 = vpack.c.b16 %v1520_v1, %v1519_v42  ;;  %v1475_v59 = vpop.permute.xlu1 %1474  ;;  %v1272_v58 = vpop.permute.xlu0 %1271 }
 0x13b   : > { %v1367_v32 = vpop.permute.xlu2 %1366  ;;  %v1542_v57 = vsel %vm1533_vm7, %v1253_v27, %v1272_v58 }
 0x13c   : > { %v1549_v20 = vsel %vm1543_vm8, %v1542_v57, %v1291_v16 }
 0x13d   : > { %1324 = vrot.lane.b32.xlu1 %v1321_v63, %s1986_s30  ;;  %1362 = vrot.lane.b32.xlu2 %v1359_v48, %s1991_s7  ;;  %s1916_s30 = sshra.s32 %s1725_s29, 4  ;;  %s1917_s30 = int_to_ptr.hbm [resolvable:$true] %s1916_s30 }
 0x13e   : > { %1343 = vrot.lane.b32.xlu0 %v1340_v14, %s1987_s3  ;;  %p1923_p1 = scmp.lt.s32.totalorder %s1917_s30, %s3208_s2 }
 0x142   : > { %v1418_v50 = vpop.permute.xlu1 %1417  ;;  %v1437_v40 = vpop.permute.xlu0 %1436 }
 0x143   : > { %v1595_v55 = vsel %vm1533_vm7, %v1399_v56, %v1418_v50 }
 0x144   : > { %v1601_v61 = vsel %vm1543_vm8, %v1595_v55, %v1437_v40 }
 0x145   : > { %1489 = vrot.lane.b32.xlu1 %v1486_v29, %s1987_s3  ;;  %1527 = vrot.lane.b32.xlu2 %v1524_v44, %s1992_s8  ;;  %v1607_v43 = vsel %vm1550_vm9, %v1601_v61, %v1456_v17  ;;  %v1248_v29 = vunpack.c.l.b16 %v2777_v60  ;;  %s1918_s3 = scalar_lea.hbm %s1917_s30, 8 }
 0x146   : > { %1508 = vrot.lane.b32.xlu0 %v1505_v38, %s1991_s7  ;;  %v1613_v63 = vsel %vm1557_vm10, %v1607_v43, %v1475_v59  ;;  %v3277_v38 = vld [vmem:[#allocation8_spill] sm:$0xff]  ;;  %p1919_p12 = scmp.ne.s32.totalorder %s1917_s30, %s1918_s3  ;;  %p1924_p2 = scmp.lt.s32.totalorder %s1922_s6, %s1918_s3 }
 0x147   : > { %v1249_v49 = vunpack.c.l.b16 %v3277_v38 }
 0x148   : > { %p1920_p13 = pnand %p1919_p12, %p2049_p4  ;;  %p1925_p3 = por %p1924_p2, %p1923_p1 }
 0x149   : > { %v1252_v54 = vpack.c.b16 %v1249_v49, %v1248_v29 }
 0x14a   : > { %v1310_v33 = vpop.permute.xlu1 %1309  ;;  %v1494_v36 = vpop.permute.xlu0 %1493  ;;  %p1921_p0 = pneg %p1920_p13 }
 0x14b   : > { %v1556_v26 = vsel %vm1550_vm9, %v1549_v20, %v1310_v33  ;;  %v1619_v46 = vsel %vm1564_vm11, %v1613_v63, %v1494_v36 }
 0x14c   : > { %v1563_v7 = vsel %vm1557_vm10, %v1556_v26, %v1329_v51  ;;  %p1926_p5 = pnand %p1925_p3, %p1921_p0 }
 0x14d   : > { %1381 = vrot.lane.b32.xlu1 %v1378_v45, %s1992_s8  ;;  %v1570_v5 = vsel %vm1564_vm11, %v1563_v7, %v3092_v13 }
 0x14e   : > { %v1577_v48 = vsel %vm1571_vm12, %v1570_v5, %v1367_v32 }
 0x155   : > { %v1289_v8 = vpop.permute.xlu2 %1288 }
 0x15d   : > { %v1532_v10 = vpop.permute.xlu2 %1531 }
 0x165   : > { %v1327_v31 = vpop.permute.xlu2 %1326 }
 0x16c   : > { %v1270_v25 = vpop.permute.xlu1 %1269 }
 0x16d   : > { %v1416_v12 = vpop.permute.xlu0 %1415  ;;  %v1346_v13 = vpop.permute.xlu2 %1345  ;;  %v1539_v28 = vsel %vm1533_vm7, %v1252_v54, %v1270_v25 }
 0x16e   : > { %v1592_v51 = vsel %vm1533_vm7, %v1398_v34, %v1416_v12  ;;  %v1547_v45 = vsel %vm1543_vm8, %v1539_v28, %v1289_v8 }
 0x174   : > { %v1513_v19 = vpop.permute.xlu1 %1512 }
 0x175   : > { %v1625_v14 = vsel %vm1571_vm12, %v1619_v46, %v1513_v19  ;;  %v1386_v47 = vpop.permute.xlu0 %1385 }
 0x176   : > { %v1586_v15 = vsel %vm1578_vm13, %v1577_v48, %v1386_v47  ;;  %v1633_v4 = vsel %vm1578_vm13, %v1625_v14, %v1532_v10 }
 0x177   : > { %v1640_v62 = vsel %vm1639_vm14, %v1586_v15, 0  ;;  %v1642_v23 = vsel %vm1639_vm14, %v1633_v4, 0  ;;  %v1287_v21 = vpop.permute.xlu2 %1286 }
 0x178   : > { %1649 = vmatpush.bf16.msra.mxu0 %v1640_v62  ;;  %1662 = vmatpush.bf16.msra.mxu1 %v1642_v23 }
 0x17d   : > { %v1308_v35 = vpop.permute.xlu0 %1307 }
 0x17e   : > { %v1435_v2 = vpop.permute.xlu1 %1434  ;;  %v1554_v60 = vsel %vm1550_vm9, %v1547_v45, %v1308_v35  ;;  %v1993_v35 = vmov 256.0  }
 0x17f   : > { %v1511_v16 = vpop.permute.xlu2 %1510  ;;  %v1599_v59 = vsel %vm1543_vm8, %v1592_v51, %v1435_v2  ;;  %v1561_v41 = vsel %vm1557_vm10, %v1554_v60, %v1327_v31  ;;  %1898 = vrcp.f32 %v1993_v35 }
 0x180   : > { %v1568_v52 = vsel %vm1564_vm11, %v1561_v41, %v1346_v13 }
 0x185   : > { %v1473_v1 = vpop.permute.xlu0 %1472 }
 0x186   : > { %v1454_v6 = vpop.permute.xlu1 %1453 }
 0x187   : > { %v1452_v39 = vpop.permute.xlu2 %1451  ;;  %v1605_v32 = vsel %vm1550_vm9, %v1599_v59, %v1454_v6 }
 0x188   : > { %v1611_v50 = vsel %vm1557_vm10, %v1605_v32, %v1473_v1 }
 0x18f   : > { %v1268_v22 = vpop.permute.xlu1 %1267  ;;  %v1471_v40 = vpop.permute.xlu2 %1470 }
 0x190   : > { %v1414_v9 = vpop.permute.xlu0 %1413  ;;  %v1536_v26 = vsel %vm1533_vm7, %v3112_v37, %v1268_v22  ;;  %v1634_v37 = vld [vmem:[%s3207_s1] sm:$0xf] }
 0x191   : > { %v1589_v56 = vsel %vm1533_vm7, %v3110_v18, %v1414_v9  ;;  %v1545_v61 = vsel %vm1543_vm8, %v1536_v26, %v1287_v21  ;;  %v1899_v21 = vpop.eup %1898 }
 0x192   : > { %v1674_v6 = vmul.f32 256.0, %v1899_v21  ;;  %vm1678_vm0 = vweird.f32 %v1899_v21 }
 0x194   : > { %v1675_v1 = vsub.f32 1.0, %v1674_v6 }
 0x196   : > { %v1676_v22 = vmul.f32 %v1899_v21, %v1675_v1 }
 0x197   : > { %v1492_v42 = vpop.permute.xlu1 %1491  ;;  %v1363_v10 = vpop.permute.xlu2 %1362 }
 0x198   : > { %v1365_v44 = vpop.permute.xlu0 %1364  ;;  %v1617_v11 = vsel %vm1564_vm11, %v1611_v50, %v1492_v42  ;;  %v1677_v9 = vadd.f32 %v1899_v21, %v1676_v22 }
 0x199   : > { %v1575_v0 = vsel %vm1571_vm12, %v1568_v52, %v1365_v44  ;;  %v1623_v36 = vsel %vm1571_vm12, %v1617_v11, %v1511_v16 }
 0x19a   : > { %v1679_v16 = vsel %vm1678_vm0, %v1899_v21, %v1677_v9 }
 0x19f   : > { %v1433_v17 = vpop.permute.xlu1 %1432  ;;  %v1528_v63 = vpop.permute.xlu2 %1527 }
 0x1a0   : > { %v1306_v58 = vpop.permute.xlu0 %1305  ;;  %v1597_v20 = vsel %vm1543_vm8, %v1589_v56, %v1433_v17 }
 0x1a1   : > { %v1603_v25 = vsel %vm1550_vm9, %v1597_v20, %v1452_v39  ;;  %v1552_v43 = vsel %vm1550_vm9, %v1545_v61, %v1306_v58 }
 0x1a2   : > { %v1609_v7 = vsel %vm1557_vm10, %v1603_v25, %v1471_v40 }
 0x1a7   : > { %v1384_v8 = vpop.permute.xlu1 %1383 }
 0x1a8   : > { %v1530_v30 = vpop.permute.xlu0 %1529  ;;  %v1583_v33 = vsel %vm1578_vm13, %v1575_v0, %v1384_v8 }
 0x1a9   : > { %1650 = vmatpush.bf16.msra.mxu0 %v1583_v33  ;;  %v1630_v27 = vsel %vm1578_vm13, %v1623_v36, %v1530_v30 }
 0x1aa   : > { %1663 = vmatpush.bf16.msra.mxu1 %v1630_v27 }
 0x1af   : > { %v1325_v57 = vpop.permute.xlu1 %1324 }
 0x1b0   : > { %v1344_v55 = vpop.permute.xlu0 %1343  ;;  %v1559_v18 = vsel %vm1557_vm10, %v1552_v43, %v1325_v57 }
 0x1b1   : > { %v1566_v14 = vsel %vm1564_vm11, %v1559_v18, %v1344_v55 }
 0x1b2   : > { %v1573_v48 = vsel %vm1571_vm12, %v1566_v14, %v1363_v10 }
 0x1b7   : > { %v1490_v12 = vpop.permute.xlu1 %1489 }
 0x1b8   : > { %v1509_v31 = vpop.permute.xlu0 %1508  ;;  %v1615_v5 = vsel %vm1564_vm11, %v1609_v7, %v1490_v12 }
 0x1b9   : > { %v1621_v46 = vsel %vm1571_vm12, %v1615_v5, %v1509_v31 }
 0x1ba   : > { %v1627_v19 = vsel %vm1578_vm13, %v1621_v46, %v1528_v63 }
 0x1bb   : > { %1664 = vmatpush.bf16.msra.mxu1 %v1627_v19 }
 0x1be   : > { %1823 = vmatmul.msk.bf16.vlgmr.msra.gmra.mxu1 %vm1635_vm15, %v1634_v37 }
 0x1bf   : > { %v1382_v47 = vpop.permute.xlu1 %1381 }
 0x1c0   : > { %v1580_v15 = vsel %vm1578_vm13, %v1573_v48, %v1382_v47 }
 0x1c1   : > { %1651 = vmatpush.bf16.msra.mxu0 %v1580_v15 }
 0x1c4   : > { %1822 = vmatmul.msk.bf16.vlgmr.msra.gmra.mxu0 %vm1635_vm15, %v1634_v37 }
 0x23b   : > { %v1666_v4 = vpop.f32.mrf.mxu1 }
 0x241   : > { %v1653_v62 = vpop.f32.mrf.mxu0 }
 0x242   : > { %v1670_v23 = vadd.f32 %v1666_v4, %v1653_v62 }
 0x243   : > { %v1668_v13 = vpop.f32.mrf.mxu1 }
 0x244   : > { %1671 = vadd.xlane.f32.xlu0 %v1670_v23 }
 0x249   : > { %v1655_v2 = vpop.f32.mrf.mxu0 }
 0x2b7   : > { %v1672_v29 = vpop.xlane.xlu0 %1671 }
 0x2b8   : > { %v1680_v42 = vmul.f32 %v1679_v16, %v1672_v29 }
 0x2ba   : > { %v1681_v38 = vsub.f32 %v1653_v62, %v1680_v42  ;;  %v1682_v49 = vsub.f32 %v1666_v4, %v1680_v42 }
 0x2bc   : > { %v1683_v44 = vmul.f32 %v1681_v38, %v1681_v38  ;;  %v1684_v53 = vmul.f32 %v1682_v49, %v1682_v49 }
 0x2be   : > { %v1685_v54 = vadd.f32 %v1684_v53, %v1683_v44 }
 0x2c0   : > { %1686 = vadd.xlane.f32.xlu1 %v1685_v54 }
 0x333   : > { %v1687_v3 = vpop.xlane.xlu1 %1686 }
 0x334   : > { %v1688_v24 = vmul.f32 %v1687_v3, %v1679_v16 }
 0x336   : > { %v1689_v39 = vadd.f32 1e-05, %v1688_v24 }
 0x338   : > { %1900 = vrsqrt.f32 %v1689_v39  ;;  %vm1696_vm2 = vweird.f32 %v1689_v39 }
 0x33e   : > { %v1901_v28 = vpop.eup %1900 }
 0x33f   : > { %v1691_v34 = vmul.f32 %v1901_v28, %v1689_v39  ;;  %vm1697_vm1 = vweird.f32 %v1901_v28 }
 0x340   : > { %vm1698_vm3 = vmor %vm1696_vm2, %vm1697_vm1 }
 0x341   : > { %v1692_v51 = vmul.f32 %v1901_v28, %v1691_v34 }
 0x343   : > { %v1693_v45 = vmul.f32 0.5, %v1692_v51 }
 0x345   : > { %v1694_v17 = vsub.f32 1.5, %v1693_v45 }
 0x347   : > { %v1695_v60 = vmul.f32 %v1901_v28, %v1694_v17 }
 0x349   : > { %v1699_v59 = vsel %vm1698_vm3, %v1901_v28, %v1695_v60 }
 0x34a   : > { %v1700_v58 = vmul.f32 %v1699_v59, %v1681_v38  ;;  %v1701_v32 = vmul.f32 %v1699_v59, %v1682_v49 }
 0x34c   : > { %v1702_v41 = vmax.f32 %v1700_v58, 0.0  ;;  %v1703_v50 = vmax.f32 %v1701_v32, 0.0 }
 0x34e   : > { %v1704_v40 = vpack.c.bf16 %v1703_v50, %v1702_v41 }
 0x350   : > { %1705 = vst [vmem:[%s163_s27] sm:$0xff] %v1704_v40 }
 0x351   : > { %1929 = shalt.err (!%p1926_p5)
}
 0x352   : > { %1831 = dma.vmem_to_hbm [thread:$0]  (%p2049_p4), %s1723_s28, 128, %s1725_s29, %s1707_s12  }
 0x353 PF: > { %p1837_p6 = scmp.ge.s32.totalorder %s1980_s14, 2  ;;  %s1736_s15 = sand.u32 1, %s1960_s9  }
 0x354   : > { %s1737_s16 = scalar_lea.sflag [#allocation3], %s1736_s15 }
 0x355   : > { %p1834_p7 = pnand %p1837_p6, %p2056_p8 }
 0x357   : > { %p1835_p9 = pneg %p1834_p7 }
 0x359   : > { %1955 = dma.done.wait (%p1835_p9), %s1737_s16, 128  }
 0x35a   : > { %1957 = vsyncadd (%p1835_p9), %s1737_s16, 4294967168  ;;  %s15_s14 = sadd.s32 1, %s1980_s14   ;;  %s3279_s9 = smov %s1964_s10 }
 0x35b   : > { %p12_p10 = scmp.ge.s32.totalorder %s15_s14, 4   ;;  %s3280_s10 = smov %s1968_s11 }
 0x35c   : > { %s3281_s11 = smov %s2062_s22  ;;  %s3282_s12 = smov %s1976_s13 }
 0x35d   : > { %s3283_s13 = smov %s3285_s17  ;;  %14 = sbr.rel (!%p12_p10) target bundleno = 4 (0x4), region = 66 }
 0x362   :  { %1743 = vsyncpa [#allocation3], 1 }
 0x363   :  { %1745 = vsyncpa [#allocation3 + $0x1], 1 }

</bundles_post_ra>
